<compile_context>
chip_gen: v7x
topology: tpu7x:2x2x1
jax: 0.10.0
libtpu: 0.0.40
codegen_flags: <defaults>
</compile_context>

<pallas_src>
import jax
import jax.numpy as jnp
from jax.experimental import pallas as pl
from jax.experimental.pallas import tpu as pltpu


def _conv1x1_fused_kernel(x_ref, w_ref, b_ref, o_ref):
    # x_ref: (1, Cin, TM)   pixels lane-dense
    # w_ref: (Cout, Cin)    VMEM-resident across all grid steps
    # b_ref: (Cout, 1)      VMEM-resident
    # o_ref: (1, Cout, TM)  pixels lane-dense
    x = x_ref[0]              # (Cin, TM)
    w = w_ref[...]            # (Cout, Cin)
    b = b_ref[...]            # (Cout, 1)
    cin = w.shape[1]          # static (=3)

    # K=3 contraction on the VPU: 3 vmul + 3 vadd per output vreg.
    v1 = w[:, 0:1] * x[0:1, :]                       # (Cout, TM)
    for c in range(1, cin):
        v1 = v1 + w[:, c:c + 1] * x[c:c + 1, :]
    v1 = v1 + b                                      # conv + bias

    # Post-ops (exactly equivalent to relu6 -> +3 -> clamp_min(0) -> clamp_max(6)):
    #   v5 = clip(v1, 0, 3) + 3 ; out = v1 * v5 / 6
    v5 = jnp.clip(v1, 0.0, 3.0) + 3.0
    o_ref[0] = v1 * v5 * (1.0 / 6.0)


def _choose_pixel_tile(P, N, target=2048):
    """Pixel tile in multiples of 128 lanes, <= target, keeping >= 2 grid
    steps along the parallel axes when the batch can't provide them."""
    n128 = -(-P // 128)                     # ceil(P / 128) lane-tiles
    tm_tiles = min(max(1, target // 128), n128)
    if N == 1:
        # keep at least 2 pixel tiles so both v7x TensorCores get work
        tm_tiles = min(tm_tiles, max(1, (n128 + 1) // 2))
    return tm_tiles * 128


def conv1x1_fused(x_nchw, weight, bias, tile_p_target=2048):
    """x_nchw: (N,Cin,H,W) f32; weight: (Cout,Cin) f32; bias: (Cout,) f32."""
    N, Cin, H, W = x_nchw.shape
    Cout = weight.shape[0]
    P = H * W

    x3 = x_nchw.reshape(N, Cin, P)       # pure reshape, no HBM transpose
    b2 = bias.reshape(Cout, 1)

    TM = _choose_pixel_tile(P, N, tile_p_target)
    grid = (N, pl.cdiv(P, TM))           # ragged P -> last tile masked

    out3 = pl.pallas_call(
        _conv1x1_fused_kernel,
        out_shape=jax.ShapeDtypeStruct((N, Cout, P), jnp.float32),
        grid=grid,
        in_specs=[
            pl.BlockSpec((1, Cin, TM), lambda n, j: (n, 0, j)),
            pl.BlockSpec((Cout, Cin), lambda n, j: (0, 0)),   # resident
            pl.BlockSpec((Cout, 1), lambda n, j: (0, 0)),     # resident
        ],
        out_specs=pl.BlockSpec((1, Cout, TM), lambda n, j: (n, 0, j)),
        compiler_params=pltpu.CompilerParams(
            dimension_semantics=("parallel", "parallel"),
            vmem_limit_bytes=48 * 1024 * 1024),
    )(x3, weight, b2)

    return out3.reshape(N, Cout, H, W)   # already NCHW order


if __name__ == "__main__":
    key = jax.random.PRNGKey(0)
    kx, kw, kb = jax.random.split(key, 3)

    # Small shapes consistent with the module: Conv2d(3, 256, kernel_size=1)
    N, Cin, H, W, Cout = 2, 3, 16, 16, 256
    x = jax.random.normal(kx, (N, Cin, H, W), dtype=jnp.float32)
    weight = jax.random.normal(kw, (Cout, Cin), dtype=jnp.float32) * 0.1
    bias = jax.random.normal(kb, (Cout,), dtype=jnp.float32) * 0.1

    out = conv1x1_fused(x, weight, bias)
    jax.block_until_ready(out)

    # Pure-JAX reference transcribing the PyTorch op chain literally.
    v1 = jnp.einsum("nchw,oc->nohw", x, weight) + bias[None, :, None, None]
    v2 = jnp.clip(v1, 0.0, 6.0)
    v3 = 3.0 + v2
    v4 = jnp.maximum(v3, 0.0)
    v5 = jnp.minimum(v4, 6.0)
    ref = v1 * v5 / 6.0

    assert out.shape == (N, Cout, H, W)
    assert jnp.allclose(out, ref, atol=1e-4, rtol=1e-4)

    print("KERNEL_OK")
</pallas_src>

<mosaic_0001>
module attributes {stable_mosaic.version = 11 : i64} {
  func.func @_conv1x1_fused_kernel(%arg0: i32, %arg1: i32, %arg2: memref<1x3x256xf32, #tpu.memory_space<vmem>>, %arg3: memref<256x3xf32, #tpu.memory_space<vmem>>, %arg4: memref<256x1xf32, #tpu.memory_space<vmem>>, %arg5: memref<1x256x256xf32, #tpu.memory_space<vmem>>) attributes {dimension_semantics = [#tpu.dimension_semantics<parallel>, #tpu.dimension_semantics<parallel>], iteration_bounds = array<i64: 2, 1>, scalar_prefetch = 0 : i64, scratch_operands = 0 : i64, tpu.core_type = #tpu.core_type<tc>, window_params = [{transform_indices = @transform_0, window_bounds = array<i64: 1, 3, 256>}, {pipeline_mode = #tpu.pipeline_mode<synchronous>, transform_indices = @transform_1, window_bounds = array<i64: 256, 3>}, {pipeline_mode = #tpu.pipeline_mode<synchronous>, transform_indices = @transform_2, window_bounds = array<i64: 256, 1>}, {transform_indices = @transform_3, window_bounds = array<i64: 1, 256, 256>}]} {
    %c0 = arith.constant 0 : index
    %c0_0 = arith.constant 0 : index
    %c0_1 = arith.constant 0 : index
    %0 = vector.load %arg2[%c0, %c0_0, %c0_1] : memref<1x3x256xf32, #tpu.memory_space<vmem>>, vector<1x3x256xf32>
    %1 = vector.shape_cast %0 : vector<1x3x256xf32> to vector<3x256xf32>
    %c0_2 = arith.constant 0 : index
    %c0_3 = arith.constant 0 : index
    %2 = vector.load %arg3[%c0_2, %c0_3] : memref<256x3xf32, #tpu.memory_space<vmem>>, vector<256x3xf32>
    %c0_4 = arith.constant 0 : index
    %c0_5 = arith.constant 0 : index
    %3 = vector.load %arg4[%c0_4, %c0_5] : memref<256x1xf32, #tpu.memory_space<vmem>>, vector<256x1xf32>
    %4 = vector.extract_strided_slice %2 {offsets = [0, 0], sizes = [256, 1], strides = [1, 1]} : vector<256x3xf32> to vector<256x1xf32>
    %5 = vector.extract_strided_slice %1 {offsets = [0, 0], sizes = [1, 256], strides = [1, 1]} : vector<3x256xf32> to vector<1x256xf32>
    %6 = vector.broadcast %4 : vector<256x1xf32> to vector<256x256xf32>
    %7 = vector.broadcast %5 : vector<1x256xf32> to vector<256x256xf32>
    %8 = arith.mulf %6, %7 : vector<256x256xf32>
    %9 = vector.extract_strided_slice %2 {offsets = [0, 1], sizes = [256, 1], strides = [1, 1]} : vector<256x3xf32> to vector<256x1xf32>
    %10 = vector.extract_strided_slice %1 {offsets = [1, 0], sizes = [1, 256], strides = [1, 1]} : vector<3x256xf32> to vector<1x256xf32>
    %11 = vector.broadcast %9 : vector<256x1xf32> to vector<256x256xf32>
    %12 = vector.broadcast %10 : vector<1x256xf32> to vector<256x256xf32>
    %13 = arith.mulf %11, %12 : vector<256x256xf32>
    %14 = arith.addf %8, %13 : vector<256x256xf32>
    %15 = vector.extract_strided_slice %2 {offsets = [0, 2], sizes = [256, 1], strides = [1, 1]} : vector<256x3xf32> to vector<256x1xf32>
    %16 = vector.extract_strided_slice %1 {offsets = [2, 0], sizes = [1, 256], strides = [1, 1]} : vector<3x256xf32> to vector<1x256xf32>
    %17 = vector.broadcast %15 : vector<256x1xf32> to vector<256x256xf32>
    %18 = vector.broadcast %16 : vector<1x256xf32> to vector<256x256xf32>
    %19 = arith.mulf %17, %18 : vector<256x256xf32>
    %20 = arith.addf %14, %19 : vector<256x256xf32>
    %21 = vector.broadcast %3 : vector<256x1xf32> to vector<256x256xf32>
    %22 = arith.addf %20, %21 : vector<256x256xf32>
    %cst = arith.constant 0.000000e+00 : f32
    %cst_6 = arith.constant 3.000000e+00 : f32
    %23 = vector.broadcast %cst : f32 to vector<256x256xf32>
    %24 = arith.maximumf %23, %22 : vector<256x256xf32>
    %25 = vector.broadcast %cst_6 : f32 to vector<256x256xf32>
    %26 = arith.minimumf %25, %24 : vector<256x256xf32>
    %cst_7 = arith.constant 3.000000e+00 : f32
    %27 = vector.broadcast %cst_7 : f32 to vector<256x256xf32>
    %28 = arith.addf %26, %27 : vector<256x256xf32>
    %29 = arith.mulf %22, %28 : vector<256x256xf32>
    %cst_8 = arith.constant 0.166666672 : f32
    %30 = vector.broadcast %cst_8 : f32 to vector<256x256xf32>
    %31 = arith.mulf %29, %30 : vector<256x256xf32>
    %c0_9 = arith.constant 0 : index
    %c0_10 = arith.constant 0 : index
    %c0_11 = arith.constant 0 : index
    %32 = vector.load %arg5[%c0_9, %c0_10, %c0_11] : memref<1x256x256xf32, #tpu.memory_space<vmem>>, vector<1x256x256xf32>
    %33 = vector.shape_cast %32 : vector<1x256x256xf32> to vector<256x256xf32>
    %34 = vector.shape_cast %31 : vector<256x256xf32> to vector<1x256x256xf32>
    tpu.vector_store %arg5[%c0_9, %c0_10, %c0_11], %34 {strides = array<i32>} : memref<1x256x256xf32, #tpu.memory_space<vmem>>, vector<1x256x256xf32>,
    return
  }
  func.func @transform_0(%arg0: i32, %arg1: i32) -> (i32, i32, i32) {
    %c0_i32 = arith.constant 0 : i32
    %c0_i32_0 = arith.constant 0 : i32
    return %arg0, %c0_i32, %arg1 : i32, i32, i32
  }
  func.func @transform_1(%arg0: i32, %arg1: i32) -> (i32, i32) {
    %c0_i32 = arith.constant 0 : i32
    %c0_i32_0 = arith.constant 0 : i32
    %c0_i32_1 = arith.constant 0 : i32
    return %c0_i32, %c0_i32_0 : i32, i32
  }
  func.func @transform_2(%arg0: i32, %arg1: i32) -> (i32, i32) {
    %c0_i32 = arith.constant 0 : i32
    %c0_i32_0 = arith.constant 0 : i32
    %c0_i32_1 = arith.constant 0 : i32
    return %c0_i32, %c0_i32_0 : i32, i32
  }
  func.func @transform_3(%arg0: i32, %arg1: i32) -> (i32, i32, i32) {
    %c0_i32 = arith.constant 0 : i32
    %c0_i32_0 = arith.constant 0 : i32
    return %arg0, %c0_i32, %arg1 : i32, i32, i32
  }
}

</mosaic_0001>

<bundles_post_ra>
// kernel: tpu_custom_call.1
= control target key start
LH: loop header
LB: loop body
LE: loop exit
PB: predicated region body
PF: predicated region fallthrough
CT: control target
= control target key end

     0   :  { %8 = vsyncpa [#allocation3], 0  ;;  %s3258_s0 = inlined_call_operand.vmem [shape: f32[2,3,256], index: 0, kind: input, shape index: {}]   ;;  %s3259_s1 = inlined_call_operand.vmem [shape: f32[256,3], index: 1, kind: input, shape index: {}]   ;;  %s3260_s2 = inlined_call_operand.vmem [shape: f32[256,1], index: 2, kind: input, shape index: {}]   ;;  %s3261_s3 = inlined_call_operand.hbm [shape: f32[2,256,256], index: 3, kind: output, shape index: {}]  }
   0x1   :  { %10 = vsyncpa [#allocation3 + $0x1], 0  ;;  %s1947_s12 = smov 0   ;;  %s1949_s13 = smov 0  }
   0x2   :  { %s1951_s14 = smov 0   ;;  %s1953_s15 = smov 0  }
   0x3   :  { %s1955_s16 = smov 0   ;;  %s1957_s17 = smov 0  }
   0x4 LB: > { %s1759_s18 = sadd.s32 4294967295, %s1919_s17   ;;  %s1760_s19 = sadd.s32 4294967294, %s1919_s17   ;;  %s1919_s17 = sphi %s1957_s17, %s16_s17   ;;  %s1915_s16 = sphi %s1955_s16, %s3445_s16   ;;  %s1911_s15 = sphi %s1953_s15, %s3444_s15   ;;  %s1907_s14 = sphi %s1951_s14, %s3443_s14   ;;  %s1903_s13 = sphi %s1949_s13, %s3442_s13   ;;  %s1899_s12 = sphi %s1947_s12, %s3441_s12  }
   0x5   : > { %s28_s20 = sadd.s32 1, %s1915_s16  ;;  %s107_s21 = sadd.s32 1, %s1907_s14 }
   0x6   : > { %p30_p0 = scmp.ge.s32.totalorder %s28_s20, 2  ;;  %p117_p1 = scmp.ne.s32.totalorder %s1907_s14, %s1903_s13 }
   0x7   : > { %p118_p2 = scmp.eq.s32.totalorder %s1759_s18, 1  ;;  %p123_p3 = scmp.ne.s32.totalorder %s1903_s13, %s1899_s12 }
   0x8   : > { %s3447_s20 = smov (%p30_p0, %s28_s20), 0  ;;  %p124_p5 = scmp.eq.s32.totalorder %s1760_s19, 1 }
   0x9   : > { %p1987_p4 = por %p118_p2, %p117_p1  ;;  %s102_s23 = ssub.s32 %s1915_s16, %s3447_s20 }
   0xa   : > { %p1763_p6 = scmp.ge.s32.totalorder %s1919_s17, 1  ;;  %p105_p7 = scmp.eq.s32.totalorder %s102_s23, 0 }
   0xb   : > { %p1994_p8 = por %p124_p5, %p123_p3  ;;  %p161_p9 = scmp.lt.s32.totalorder %s1919_s17, 3 }
   0xc   : > { %s2000_s25 = scalar_select %p105_p7, %s1907_s14, %s107_s21  }
   0xd   : > { %p162_p10 = pnand %p1763_p6, %p161_p9 }
   0xf   : > { %165 = sbr.rel (%p162_p10) target bundleno = 465 (0x1d1), region = 32 }
  0x16   : > { %v2005_v0 = vld [vmem:[%s3259_s1 + $0x10] sm:$0xff]  ;;  %v2010_v1 = vld [vmem:[%s3259_s1] sm:$0xff]  ;;  %v1921_v2 = vmov 1   ;;  %v1922_v3 = vmov 0   ;;  %v2018_v4 = vld [vmem:[%s3259_s1 + $0x18] sm:$0xff]  ;;  %v1923_v20 = vmov 2  }
  0x17   : > { %1835 = vset.pattern.permute.xlu0 %v1921_v2  ;;  %1834 = vset.pattern.permute.xlu1 %v1922_v3  ;;  %v2025_v5 = vld [vmem:[%s3259_s1 + $0x28] sm:$0xff]  ;;  %v2032_v6 = vld [vmem:[%s3259_s1 + $0x38] sm:$0xff]  ;;  %v205_v21 = vld [vmem:[%s3259_s1 + $0x20] sm:$0xff]  ;;  %p190_p11 = scmp.lt.s32.totalorder %s1911_s15, 1  ;;  %s186_s19 = sand.u32 1, %s1903_s13  }
  0x18   : > { %277 = vperm.xlu1 %1834, %v2005_v0   ;;  %509 = vperm.xlu0 %1835, %v2010_v1   ;;  %v2039_v7 = vld [vmem:[%s3259_s1 + $0x48] sm:$0xff]  ;;  %v2046_v8 = vld [vmem:[%s3259_s1 + $0x58] sm:$0xff]  ;;  %v207_v22 = vld [vmem:[%s3259_s1 + $0x30] sm:$0xff]  ;;  %s1764_s21 = sshll.u32 %s186_s19, 9  ;;  %s1773_s26 = sshll.u32 %s1911_s15, 13 }
  0x19   : > { %v2053_v9 = vld [vmem:[%s3259_s1 + $0x68] sm:$0xff]  ;;  %v2060_v10 = vld [vmem:[%s3259_s1 + $0x78] sm:$0xff]  ;;  %v209_v23 = vld [vmem:[%s3259_s1 + $0x40] sm:$0xff]  ;;  %s191_s10 = scalar_select %p190_p11, %s1911_s15, 1 }
  0x1a   : > { %v2067_v11 = vld [vmem:[%s3259_s1 + $0x88] sm:$0xff]  ;;  %v2074_v12 = vld [vmem:[%s3259_s1 + $0x98] sm:$0xff]  ;;  %v211_v24 = vld [vmem:[%s3259_s1 + $0x50] sm:$0xff]  ;;  %s3202_s29 = scalar_lea.hbm %s3261_s3, %s1773_s26  ;;  %s3212_s30 = scalar_lea.sflag [#allocation3], %s186_s19 }
  0x1b   : > { %v2081_v13 = vld [vmem:[%s3259_s1 + $0xa8] sm:$0xff]  ;;  %v2088_v14 = vld [vmem:[%s3259_s1 + $0xb8] sm:$0xff]  ;;  %v213_v25 = vld [vmem:[%s3259_s1 + $0x60] sm:$0xff]  ;;  %s1772_s23 = sshll.u32 %s191_s10, 3 }
  0x1c   : > { %282 = vperm.xlu1 %1834, %v2018_v4   ;;  %521 = vperm.xlu0 %1835, %v2018_v4   ;;  %v2095_v15 = vld [vmem:[%s3259_s1 + $0xc8] sm:$0xff]  ;;  %v2102_v16 = vld [vmem:[%s3259_s1 + $0xd8] sm:$0xff]  ;;  %v215_v26 = vld [vmem:[%s3259_s1 + $0x70] sm:$0xff]  ;;  %s197_s5 = scalar_lea.vmem %s3258_s0, %s1772_s23  ;;  %s3079_s23 = scalar_lea.vmem [#allocation2], %s1764_s21 }
  0x1d   : > { %v2109_v17 = vld [vmem:[%s3259_s1 + $0xe8] sm:$0xff]  ;;  %v2116_v18 = vld [vmem:[%s3259_s1 + $0xf8] sm:$0xff]  ;;  %v217_v27 = vld [vmem:[%s3259_s1 + $0x80] sm:$0xff]  ;;  %s1680_s27 = sshll.u32 %s3079_s23, 4  ;;  %s3204_s27 = int_to_ptr.vmem [resolvable:$true] %s1680_s27 }
  0x1e   : > { %v202_v19 = vld [vmem:[%s3259_s1 + $0x8] sm:$0xff]  ;;  %v219_v28 = vld [vmem:[%s3259_s1 + $0x90] sm:$0xff]  ;;  %v221_v29 = vld [vmem:[%s3259_s1 + $0xa0] sm:$0xff]  ;;  %s1841_s4 = scalar_lea.vmem %s3204_s27, 8192 }
  0x1f   : > { %v223_v30 = vld [vmem:[%s3259_s1 + $0xb0] sm:$0xff]  ;;  %v225_v31 = vld [vmem:[%s3259_s1 + $0xc0] sm:$0xff]  ;;  %p1842_p12 = scmp.ne.s32.totalorder %s3204_s27, %s1841_s4 }
  0x20   : > { %292 = vperm.xlu1 %1834, %v2025_v5   ;;  %529 = vperm.xlu0 %1835, %v2025_v5   ;;  %v2160_v32 = vld [vmem:[%s3259_s1 + $0xd0] sm:$0xff]  ;;  %v2166_v33 = vld [vmem:[%s3259_s1 + $0xe0] sm:$0xff] }
  0x21   : > { %v2173_v34 = vld [vmem:[%s3259_s1 + $0xf0] sm:$0xff]  ;;  %p1843_p13 = pnand %p1842_p12, %p1987_p4 }
  0x23   : > { %p1844_p0 = pneg %p1843_p13 }
  0x24   : > { %302 = vperm.xlu1 %1834, %v2032_v6   ;;  %537 = vperm.xlu0 %1835, %v2032_v6  }
  0x28   : > { %312 = vperm.xlu1 %1834, %v2039_v7   ;;  %545 = vperm.xlu0 %1835, %v2039_v7  }
  0x2c   : > { %322 = vperm.xlu1 %1834, %v2046_v8   ;;  %553 = vperm.xlu0 %1835, %v2046_v8  }
  0x30   : > { %332 = vperm.xlu1 %1834, %v2053_v9   ;;  %561 = vperm.xlu0 %1835, %v2053_v9  }
  0x34   : > { %342 = vperm.xlu1 %1834, %v2060_v10   ;;  %569 = vperm.xlu0 %1835, %v2060_v10  }
  0x38   : > { %352 = vperm.xlu1 %1834, %v2067_v11   ;;  %577 = vperm.xlu0 %1835, %v2067_v11  }
  0x3c   : > { %362 = vperm.xlu1 %1834, %v2074_v12   ;;  %585 = vperm.xlu0 %1835, %v2074_v12  }
  0x40   : > { %372 = vperm.xlu1 %1834, %v2081_v13   ;;  %593 = vperm.xlu0 %1835, %v2081_v13  }
  0x44   : > { %382 = vperm.xlu1 %1834, %v2088_v14   ;;  %601 = vperm.xlu0 %1835, %v2088_v14  }
  0x48   : > { %392 = vperm.xlu1 %1834, %v2095_v15   ;;  %609 = vperm.xlu0 %1835, %v2095_v15  }
  0x4c   : > { %402 = vperm.xlu1 %1834, %v2102_v16   ;;  %617 = vperm.xlu0 %1835, %v2102_v16  }
  0x50   : > { %412 = vperm.xlu1 %1834, %v2109_v17   ;;  %625 = vperm.xlu0 %1835, %v2109_v17  }
  0x54   : > { %422 = vperm.xlu1 %1834, %v2116_v18   ;;  %633 = vperm.xlu0 %1835, %v2116_v18  }
  0x58   : > { %1836 = vset.pattern.permute.xlu1 %v1921_v2  ;;  %1838 = vset.pattern.permute.xlu0 %v1923_v20 }
  0x59   : > { %513 = vperm.xlu1 %1836, %v202_v19   ;;  %787 = vperm.xlu0 %1838, %v202_v19  }
  0x5d   : > { %517 = vperm.xlu1 %1836, %v2005_v0   ;;  %799 = vperm.xlu0 %1838, %v205_v21  }
  0x61   : > { %525 = vperm.xlu1 %1836, %v205_v21   ;;  %807 = vperm.xlu0 %1838, %v207_v22  }
  0x65   : > { %533 = vperm.xlu1 %1836, %v207_v22   ;;  %815 = vperm.xlu0 %1838, %v209_v23  }
  0x69   : > { %541 = vperm.xlu1 %1836, %v209_v23   ;;  %823 = vperm.xlu0 %1838, %v211_v24  }
  0x6d   : > { %549 = vperm.xlu1 %1836, %v211_v24   ;;  %831 = vperm.xlu0 %1838, %v213_v25  }
  0x71   : > { %557 = vperm.xlu1 %1836, %v213_v25   ;;  %839 = vperm.xlu0 %1838, %v215_v26  }
  0x75   : > { %565 = vperm.xlu1 %1836, %v215_v26   ;;  %847 = vperm.xlu0 %1838, %v217_v27  }
  0x79   : > { %573 = vperm.xlu1 %1836, %v217_v27   ;;  %855 = vperm.xlu0 %1838, %v219_v28  }
  0x7d   : > { %581 = vperm.xlu1 %1836, %v219_v28   ;;  %863 = vperm.xlu0 %1838, %v221_v29  }
  0x81   : > { %589 = vperm.xlu1 %1836, %v221_v29   ;;  %871 = vperm.xlu0 %1838, %v223_v30  }
  0x85   : > { %597 = vperm.xlu1 %1836, %v223_v30   ;;  %879 = vperm.xlu0 %1838, %v225_v31  }
  0x89   : > { %605 = vperm.xlu1 %1836, %v225_v31   ;;  %887 = vperm.xlu0 %1838, %v2160_v32  }
  0x8d   : > { %613 = vperm.xlu1 %1836, %v2160_v32   ;;  %895 = vperm.xlu0 %1838, %v2166_v33  }
  0x91   : > { %621 = vperm.xlu1 %1836, %v2166_v33   ;;  %903 = vperm.xlu0 %1838, %v2173_v34  }
  0x95   : > { %629 = vperm.xlu1 %1836, %v2173_v34   ;;  %1839 = vset.pattern.permute.xlu0 %v1922_v3 }
  0x96   : > { %267 = vperm.xlu0 %1839, %v2010_v1  }
  0x97   : > { %v2180_v35 = vpop.permute.xlu1 %277  ;;  %v2182_v36 = vpop.permute.xlu0 %509 }
  0x99   : > { %1837 = vset.pattern.permute.xlu1 %v1923_v20 }
  0x9a   : > { %783 = vperm.xlu1 %1837, %v2010_v1   ;;  %272 = vperm.xlu0 %1839, %v202_v19   ;;  %v244_v19 = vld [vmem:[%s3260_s2 + $0x58] sm:$0xff] }
  0x9b   : > { %v2185_v37 = vpop.permute.xlu1 %282  ;;  %v2187_v38 = vpop.permute.xlu0 %521 }
  0x9e   : > { %791 = vperm.xlu1 %1837, %v2005_v0   ;;  %287 = vperm.xlu0 %1839, %v205_v21  }
  0x9f   : > { %v2190_v39 = vpop.permute.xlu1 %292  ;;  %v2192_v40 = vpop.permute.xlu0 %529 }
  0xa2   : > { %795 = vperm.xlu1 %1837, %v2018_v4   ;;  %297 = vperm.xlu0 %1839, %v207_v22   ;;  %v233_v4 = vld [vmem:[%s3260_s2] sm:$0xff]  ;;  %v239_v22 = vld [vmem:[%s3260_s2 + $0x30] sm:$0xff] }
  0xa3   : > { %v2195_v41 = vpop.permute.xlu1 %302  ;;  %v2197_v42 = vpop.permute.xlu0 %537 }
  0xa6   : > { %803 = vperm.xlu1 %1837, %v2025_v5   ;;  %307 = vperm.xlu0 %1839, %v209_v23   ;;  %v236_v5 = vld [vmem:[%s3260_s2 + $0x18] sm:$0xff]  ;;  %v246_v23 = vld [vmem:[%s3260_s2 + $0x68] sm:$0xff] }
  0xa7   : > { %v2200_v43 = vpop.permute.xlu1 %312  ;;  %v2202_v44 = vpop.permute.xlu0 %545 }
  0xaa   : > { %811 = vperm.xlu1 %1837, %v2032_v6   ;;  %317 = vperm.xlu0 %1839, %v211_v24  }
  0xab   : > { %v2205_v45 = vpop.permute.xlu1 %322  ;;  %v2207_v46 = vpop.permute.xlu0 %553 }
  0xae   : > { %819 = vperm.xlu1 %1837, %v2039_v7   ;;  %327 = vperm.xlu0 %1839, %v213_v25  }
  0xaf   : > { %v2210_v47 = vpop.permute.xlu1 %332  ;;  %v2212_v48 = vpop.permute.xlu0 %561 }
  0xb2   : > { %827 = vperm.xlu1 %1837, %v2046_v8   ;;  %337 = vperm.xlu0 %1839, %v215_v26   ;;  %v238_v8 = vld [vmem:[%s3260_s2 + $0x28] sm:$0xff]  ;;  %v241_v26 = vld [vmem:[%s3260_s2 + $0x40] sm:$0xff] }
  0xb3   : > { %v2215_v49 = vpop.permute.xlu1 %342  ;;  %v2217_v50 = vpop.permute.xlu0 %569 }
  0xb6   : > { %835 = vperm.xlu1 %1837, %v2053_v9   ;;  %347 = vperm.xlu0 %1839, %v217_v27   ;;  %v248_v27 = vld [vmem:[%s3260_s2 + $0x78] sm:$0xff] }
  0xb7   : > { %v2220_v51 = vpop.permute.xlu1 %352  ;;  %v2222_v52 = vpop.permute.xlu0 %577 }
  0xba   : > { %843 = vperm.xlu1 %1837, %v2060_v10   ;;  %357 = vperm.xlu0 %1839, %v219_v28  }
  0xbb   : > { %v2225_v53 = vpop.permute.xlu1 %362  ;;  %v2227_v54 = vpop.permute.xlu0 %585 }
  0xbe   : > { %851 = vperm.xlu1 %1837, %v2067_v11   ;;  %367 = vperm.xlu0 %1839, %v221_v29   ;;  %v234_v11 = vld [vmem:[%s3260_s2 + $0x8] sm:$0xff] }
  0xbf   : > { %v2230_v55 = vpop.permute.xlu1 %372  ;;  %v2232_v56 = vpop.permute.xlu0 %593 }
  0xc2   : > { %859 = vperm.xlu1 %1837, %v2074_v12   ;;  %377 = vperm.xlu0 %1839, %v223_v30   ;;  %v240_v12 = vld [vmem:[%s3260_s2 + $0x38] sm:$0xff]  ;;  %v243_v30 = vld [vmem:[%s3260_s2 + $0x50] sm:$0xff] }
  0xc3   : > { %v2235_v57 = vpop.permute.xlu1 %382  ;;  %v2237_v58 = vpop.permute.xlu0 %601 }
  0xc6   : > { %867 = vperm.xlu1 %1837, %v2081_v13   ;;  %387 = vperm.xlu0 %1839, %v225_v31   ;;  %v250_v31 = vld [vmem:[%s3260_s2 + $0x88] sm:$0xff] }
  0xc7   : > { %v2240_v59 = vpop.permute.xlu1 %392  ;;  %v2242_v60 = vpop.permute.xlu0 %609 }
  0xca   : > { %875 = vperm.xlu1 %1837, %v2088_v14   ;;  %397 = vperm.xlu0 %1839, %v2160_v32  }
  0xcb   : > { %v2246_v61 = vpop.permute.xlu1 %402  ;;  %v2248_v62 = vpop.permute.xlu0 %617 }
  0xcc   : > { %3291 = vst [vmem:[#allocation5_spill] sm:$0xff] %v2248_v62 }
  0xce   : > { %883 = vperm.xlu1 %1837, %v2095_v15   ;;  %407 = vperm.xlu0 %1839, %v2166_v33   ;;  %v235_v15 = vld [vmem:[%s3260_s2 + $0x10] sm:$0xff] }
  0xcf   : > { %v2252_v63 = vpop.permute.xlu1 %412  ;;  %v2254_v0 = vpop.permute.xlu0 %625 }
  0xd0   : > { %3292 = vst [vmem:[#allocation6_spill] sm:$0xff] %v2252_v63  ;;  %3293 = vst [vmem:[#allocation7_spill] sm:$0xff] %v2254_v0 }
  0xd2   : > { %891 = vperm.xlu1 %1837, %v2102_v16   ;;  %417 = vperm.xlu0 %1839, %v2173_v34   ;;  %v245_v34 = vld [vmem:[%s3260_s2 + $0x60] sm:$0xff] }
  0xd3   : > { %v2258_v1 = vpop.permute.xlu1 %422  ;;  %v2260_v2 = vpop.permute.xlu0 %633 }
  0xd4   : > { %3294 = vst [vmem:[#allocation8_spill] sm:$0xff] %v2258_v1  ;;  %3295 = vst [vmem:[#allocation9_spill] sm:$0xff] %v2260_v2 }
  0xd6   : > { %899 = vperm.xlu1 %1837, %v2109_v17   ;;  %1058 = vperm.xlu0 %1839, %v233_v4   ;;  %v426_v4 = vlaneseq }
  0xd8   : > { %v2269_v6 = vpop.permute.xlu1 %513  ;;  %v2271_v7 = vpop.permute.xlu0 %787 }
  0xda   : > { %907 = vperm.xlu1 %1837, %v2116_v18   ;;  %1073 = vperm.xlu0 %1839, %v236_v5   ;;  %v237_v18 = vld [vmem:[%s3260_s2 + $0x20] sm:$0xff]  ;;  %v252_v5 = vld [vmem:[%s3260_s2 + $0x98] sm:$0xff] }
  0xdc   : > { %v2277_v9 = vpop.permute.xlu1 %517  ;;  %v2279_v10 = vpop.permute.xlu0 %799 }
  0xde   : > { %1840 = vset.pattern.permute.xlu1 %v1922_v3  ;;  %1083 = vperm.xlu0 %1839, %v238_v8   ;;  %v242_v3 = vld [vmem:[%s3260_s2 + $0x48] sm:$0xff] }
  0xdf   : > { %1063 = vperm.xlu1 %1840, %v234_v11  }
  0xe0   : > { %v2288_v13 = vpop.permute.xlu1 %525  ;;  %v2290_v14 = vpop.permute.xlu0 %807 }
  0xe2   : > { %1093 = vperm.xlu0 %1839, %v240_v12   ;;  %v247_v12 = vld [vmem:[%s3260_s2 + $0x70] sm:$0xff] }
  0xe3   : > { %1068 = vperm.xlu1 %1840, %v235_v15   ;;  %v427_v15 = vshrl.u32 %v426_v4, 7 }
  0xe4   : > { %v2298_v16 = vpop.permute.xlu1 %533  ;;  %v2300_v17 = vpop.permute.xlu0 %815 }
  0xe6   : > { %1103 = vperm.xlu0 %1839, %v242_v3   ;;  %v254_v3 = vld [vmem:[%s3260_s2 + $0xa8] sm:$0xff] }
  0xe7   : > { %1078 = vperm.xlu1 %1840, %v237_v18  }
  0xe8   : > { %v2308_v20 = vpop.permute.xlu1 %541  ;;  %v2310_v21 = vpop.permute.xlu0 %823 }
  0xe9   : > { %3296 = vst [vmem:[#allocation10_spill] sm:$0xff] %v2310_v21 }
  0xea   : > { %1113 = vperm.xlu0 %1839, %v244_v19  }
  0xeb   : > { %1088 = vperm.xlu1 %1840, %v239_v22   ;;  %v249_v22 = vld [vmem:[%s3260_s2 + $0x80] sm:$0xff] }
  0xec   : > { %v2318_v24 = vpop.permute.xlu1 %549  ;;  %v2320_v25 = vpop.permute.xlu0 %831 }
  0xed   : > { %3297 = vst [vmem:[#allocation11_spill] sm:$0xff] %v2320_v25 }
  0xee   : > { %1123 = vperm.xlu0 %1839, %v246_v23   ;;  %v638_v23 = vsub.s32 1, %v427_v15 }
  0xef   : > { %1098 = vperm.xlu1 %1840, %v241_v26   ;;  %v642_v26 = vsub.s32 5, %v427_v15 }
  0xf0   : > { %v2328_v28 = vpop.permute.xlu1 %557  ;;  %v2330_v29 = vpop.permute.xlu0 %839 }
  0xf1   : > { %3298 = vst [vmem:[#allocation12_spill] sm:$0xff] %v2328_v28  ;;  %3299 = vst [vmem:[#allocation13_spill] sm:$0xff] %v2330_v29 }
  0xf2   : > { %1133 = vperm.xlu0 %1839, %v248_v27   ;;  %v428_v27 = vsub.s32 0, %v427_v15 }
  0xf3   : > { %1108 = vperm.xlu1 %1840, %v243_v30   ;;  %v432_v30 = vsub.s32 4, %v427_v15 }
  0xf4   : > { %v2339_v32 = vpop.permute.xlu1 %565  ;;  %v2341_v33 = vpop.permute.xlu0 %847 }
  0xf5   : > { %3300 = vst [vmem:[#allocation14_spill] sm:$0xff] %v2339_v32  ;;  %3301 = vst [vmem:[#allocation15_spill] sm:$0xff] %v2341_v33  ;;  %v916_v33 = vsub.s32 6, %v427_v15 }
  0xf6   : > { %1143 = vperm.xlu0 %1839, %v250_v31   ;;  %v256_v31 = vld [vmem:[%s3260_s2 + $0xb8] sm:$0xff] }
  0xf7   : > { %1118 = vperm.xlu1 %1840, %v245_v34   ;;  %v200_v34 = vld [vmem:[%s197_s5] sm:$0x77]  ;;  %s1924_s5 = smov [#allocation2]  }
  0xf8   : > { %v2350_v8 = vpop.permute.xlu1 %573  ;;  %v2352_v11 = vpop.permute.xlu0 %855  ;;  %s1845_s6 = sshll.u32 %s1924_s5, 4  ;;  %s1846_s6 = int_to_ptr.vmem [resolvable:$false] %s1845_s6 }
  0xf9   : > { %3302 = vst [vmem:[#allocation16_spill] sm:$0xff] %v2350_v8  ;;  %3303 = vst [vmem:[#allocation17_spill] sm:$0xff] %v2352_v11  ;;  %v433_v11 = vrot.slane %v200_v34, %v432_v30  ;;  %v912_v8 = vsub.s32 2, %v427_v15  ;;  %v260_v15 = vld [vmem:[%s3260_s2 + $0xd8] sm:$0xff]  ;;  %s1847_s7 = scalar_lea.vmem %s1846_s6, 16384  ;;  %p1848_p1 = scmp.lt.s32.totalorder %s3204_s27, %s1846_s6 }
  0xfa   : > { %1153 = vperm.xlu0 %1839, %v252_v5   ;;  %p1849_p2 = scmp.lt.s32.totalorder %s1847_s7, %s1841_s4 }
  0xfb   : > { %1128 = vperm.xlu1 %1840, %v247_v12   ;;  %v251_v12 = vld [vmem:[%s3260_s2 + $0x90] sm:$0xff] }
  0xfc   : > { %v2360_v18 = vpop.permute.xlu1 %581  ;;  %v2362_v19 = vpop.permute.xlu0 %863  ;;  %p1850_p3 = por %p1849_p2, %p1848_p1 }
  0xfd   : > { %3304 = vst [vmem:[#allocation18_spill] sm:$0xff] %v2360_v18  ;;  %3305 = vst [vmem:[#allocation19_spill] sm:$0xff] %v2362_v19  ;;  %v639_v19 = vrot.slane %v200_v34, %v638_v23  ;;  %v643_v18 = vrot.slane %v200_v34, %v642_v26 }
  0xfe   : > { %1163 = vperm.xlu0 %1839, %v254_v3   ;;  %v429_v3 = vrot.slane %v200_v34, %v428_v27  ;;  %p1851_p5 = pnand %p1850_p3, %p1844_p0 }
  0xff   : > { %1138 = vperm.xlu1 %1840, %v249_v22   ;;  %v258_v22 = vld [vmem:[%s3260_s2 + $0xc8] sm:$0xff]  ;;  %v2390_v32 = vrot.slane %v639_v19, %v638_v23  ;;  %v2392_v26 = vrot.slane %v643_v18, %v638_v23  ;;  %v255_v18 = vld [vmem:[%s3260_s2 + $0xb0] sm:$0xff] }
 0x100   : > { %v2373_v4 = vpop.permute.xlu1 %589  ;;  %v2375_v5 = vpop.permute.xlu0 %871  ;;  %v2394_v30 = vrot.slane %v429_v3, %v428_v27 }
 0x101   : > { %3306 = vst [vmem:[#allocation20_spill] sm:$0xff] %v2373_v4  ;;  %3307 = vst [vmem:[#allocation21_spill] sm:$0xff] %v2375_v5  ;;  %v253_v5 = vld [vmem:[%s3260_s2 + $0xa0] sm:$0xff]  ;;  %v660_v23 = vmul.f32 %v2390_v32, %v2187_v38  ;;  %v665_v3 = vmul.f32 %v2392_v26, %v2192_v40 }
 0x102   : > { %1173 = vperm.xlu0 %1839, %v256_v31   ;;  %v2396_v31 = vrot.slane %v433_v11, %v428_v27  ;;  %v450_v19 = vmul.f32 %v2394_v30, %v2185_v37  ;;  %v454_v27 = vmul.f32 %v2394_v30, %v2190_v39 }
 0x103   : > { %1148 = vperm.xlu1 %1840, %v251_v12   ;;  %v913_v12 = vrot.slane %v200_v34, %v912_v8 }
 0x104   : > { %v2383_v29 = vpop.permute.xlu1 %597  ;;  %v2385_v4 = vpop.permute.xlu0 %879  ;;  %v451_v11 = vmul.f32 %v2396_v31, %v2185_v37  ;;  %v262_v37 = vld [vmem:[%s3260_s2 + $0xe8] sm:$0xff]  ;;  %v459_v2 = vmul.f32 %v2396_v31, %v2195_v41 }
 0x105   : > { %3308 = vst [vmem:[#allocation22_spill] sm:$0xff] %v2383_v29  ;;  %3309 = vst [vmem:[#allocation23_spill] sm:$0xff] %v2385_v4  ;;  %v917_v4 = vrot.slane %v200_v34, %v916_v33  ;;  %v661_v33 = vmul.f32 %v2392_v26, %v2187_v38  ;;  %v455_v34 = vmul.f32 %v2396_v31, %v2190_v39  ;;  %v257_v39 = vld [vmem:[%s3260_s2 + $0xc0] sm:$0xff] }
 0x106   : > { %1183 = vperm.xlu0 %1839, %v258_v22   ;;  %v2427_v22 = vrot.slane %v913_v12, %v912_v8  ;;  %v2454_v12 = vadd.f32 %v660_v23, %v450_v19  ;;  %v264_v19 = vld [vmem:[%s3260_s2 + $0xf8] sm:$0xff]  ;;  %v463_v23 = vmul.f32 %v2396_v31, %v2200_v43 }
 0x107   : > { %1158 = vperm.xlu1 %1840, %v253_v5   ;;  %v664_v5 = vmul.f32 %v2390_v32, %v2192_v40  ;;  %v2429_v38 = vrot.slane %v917_v4, %v912_v8  ;;  %v2440_v40 = vmul.f32 %v2394_v30, %v2180_v35  ;;  %v2448_v8 = vmul.f32 %v2390_v32, %v2182_v36 }
 0x108   : > { %v2401_v29 = vpop.permute.xlu1 %605  ;;  %v2403_v25 = vpop.permute.xlu0 %887  ;;  %v2452_v4 = vmul.f32 %v2392_v26, %v2182_v36  ;;  %3316 = vst [vmem:[#allocation30_spill] sm:$0xff] %v2454_v12  ;;  %v669_v36 = vmul.f32 %v2392_v26, %v2197_v42  ;;  %v685_v12 = vmul.f32 %v2392_v26, %v2217_v50 }
 0x109   : > { %3310 = vst [vmem:[#allocation24_spill] sm:$0xff] %v2401_v29  ;;  %3311 = vst [vmem:[#allocation25_spill] sm:$0xff] %v2403_v25 }
 0x10a   : > { %1193 = vperm.xlu0 %1839, %v260_v15   ;;  %v2444_v15 = vmul.f32 %v2396_v31, %v2180_v35  ;;  %3314 = vst [vmem:[#allocation28_spill] sm:$0xff] %v2448_v8  ;;  %3315 = vst [vmem:[#allocation29_spill] sm:$0xff] %v2452_v4  ;;  %v458_v35 = vmul.f32 %v2394_v30, %v2195_v41  ;;  %v668_v8 = vmul.f32 %v2390_v32, %v2197_v42 }
 0x10b   : > { %1168 = vperm.xlu1 %1840, %v255_v18   ;;  %v2456_v18 = vadd.f32 %v661_v33, %v451_v11  ;;  %v462_v11 = vmul.f32 %v2394_v30, %v2200_v43  ;;  %v672_v41 = vmul.f32 %v2390_v32, %v2202_v44  ;;  %v673_v33 = vmul.f32 %v2392_v26, %v2202_v44 }
 0x10c   : > { %v2431_v25 = vpop.permute.xlu1 %613  ;;  %v2433_v29 = vpop.permute.xlu0 %895  ;;  %v467_v43 = vmul.f32 %v2396_v31, %v2205_v45  ;;  %v677_v44 = vmul.f32 %v2392_v26, %v2207_v46  ;;  %v689_v4 = vmul.f32 %v2392_v26, %v2222_v52 }
 0x10d   : > { %3312 = vst [vmem:[#allocation26_spill] sm:$0xff] %v2431_v25  ;;  %3313 = vst [vmem:[#allocation27_spill] sm:$0xff] %v2433_v29  ;;  %v2458_v29 = vadd.f32 %v664_v5, %v454_v27  ;;  %v2460_v25 = vadd.f32 %v665_v3, %v455_v34  ;;  %v259_v34 = vld [vmem:[%s3260_s2 + $0xd0] sm:$0xff]  ;;  %v466_v5 = vmul.f32 %v2394_v30, %v2205_v45 }
 0x10e   : > { %3317 = vst [vmem:[#allocation31_spill] sm:$0xff] %v2456_v18  ;;  %1203 = vperm.xlu0 %1839, %v262_v37   ;;  %v676_v3 = vmul.f32 %v2390_v32, %v2207_v46  ;;  %v470_v37 = vmul.f32 %v2394_v30, %v2210_v47  ;;  %v474_v45 = vmul.f32 %v2394_v30, %v2215_v49 }
 0x10f   : > { %3318 = vst [vmem:[#allocation32_spill] sm:$0xff] %v2458_v29  ;;  %3319 = vst [vmem:[#allocation33_spill] sm:$0xff] %v2460_v25  ;;  %1178 = vperm.xlu1 %1840, %v257_v39   ;;  %v471_v39 = vmul.f32 %v2396_v31, %v2210_v47  ;;  %v680_v25 = vmul.f32 %v2390_v32, %v2212_v48  ;;  %v681_v29 = vmul.f32 %v2392_v26, %v2212_v48 }
 0x110   : > { %v2481_v27 = vpop.permute.xlu1 %621  ;;  %v2483_v42 = vpop.permute.xlu0 %903  ;;  %v475_v18 = vmul.f32 %v2396_v31, %v2215_v49  ;;  %v684_v46 = vmul.f32 %v2390_v32, %v2217_v50  ;;  %v478_v47 = vmul.f32 %v2394_v30, %v2220_v51  ;;  %v479_v48 = vmul.f32 %v2396_v31, %v2220_v51 }
 0x111   : > { %3320 = vst [vmem:[#allocation34_spill] sm:$0xff] %v2481_v27  ;;  %3321 = vst [vmem:[#allocation35_spill] sm:$0xff] %v2483_v42  ;;  %v261_v42 = vld [vmem:[%s3260_s2 + $0xe0] sm:$0xff]  ;;  %v482_v50 = vmul.f32 %v2394_v30, %v2225_v53  ;;  %v692_v51 = vmul.f32 %v2390_v32, %v2227_v54  ;;  %v693_v27 = vmul.f32 %v2392_v26, %v2227_v54 }
 0x112   : > { %1213 = vperm.xlu0 %1839, %v264_v19   ;;  %v688_v19 = vmul.f32 %v2390_v32, %v2222_v52  ;;  %v2535_v52 = vadd.f32 %v668_v8, %v458_v35  ;;  %v2539_v28 = vadd.f32 %v672_v41, %v462_v11  ;;  %v2541_v21 = vadd.f32 %v673_v33, %v463_v23  ;;  %v263_v35 = vld [vmem:[%s3260_s2 + $0xf0] sm:$0xff] }
 0x113   : > { %1188 = vperm.xlu1 %1840, %v259_v34   ;;  %v483_v34 = vmul.f32 %v2396_v31, %v2225_v53  ;;  %v2543_v0 = vadd.f32 %v676_v3, %v466_v5  ;;  %v2545_v63 = vadd.f32 %v677_v44, %v467_v43  ;;  %v2547_v53 = vadd.f32 %v680_v25, %v470_v37 }
 0x114   : > { %v2520_v49 = vpop.permute.xlu1 %629  ;;  %v2549_v62 = vadd.f32 %v681_v29, %v471_v39  ;;  %v2551_v54 = vadd.f32 %v684_v46, %v474_v45  ;;  %v2555_v8 = vadd.f32 %v688_v19, %v478_v47  ;;  %v658_v25 = vmul.f32 %v2390_v32, %v2277_v9 }
 0x115   : > { %3322 = vst [vmem:[#allocation36_spill] sm:$0xff] %v2520_v49  ;;  %v2533_v1 = vpop.permute.xlu0 %267  ;;  %v2537_v49 = vadd.f32 %v669_v36, %v459_v2  ;;  %v2557_v2 = vadd.f32 %v689_v4, %v479_v48  ;;  %v2562_v36 = vadd.f32 %v692_v51, %v482_v50  ;;  %v2564_v11 = vadd.f32 %v693_v27, %v483_v34 }
 0x116   : > { %3323 = vst [vmem:[#allocation37_spill] sm:$0xff] %v2533_v1  ;;  %v2553_v1 = vadd.f32 %v685_v12, %v475_v18  ;;  %v659_v29 = vmul.f32 %v2392_v26, %v2277_v9  ;;  %v656_v4 = vmul.f32 %v2390_v32, %v2269_v6  ;;  %v657_v23 = vmul.f32 %v2392_v26, %v2269_v6 }
 0x117   : > { %1198 = vperm.xlu1 %1840, %v261_v42   ;;  %3324 = vst [vmem:[#allocation38_spill] sm:$0xff] %v2562_v36  ;;  %3325 = vst [vmem:[#allocation39_spill] sm:$0xff] %v2564_v11  ;;  %v486_v27 = vmul.f32 %v2394_v30, %v2230_v55  ;;  %v487_v42 = vmul.f32 %v2396_v31, %v2230_v55  ;;  %v696_v9 = vmul.f32 %v2390_v32, %v2232_v56 }
 0x118   : > { %v697_v5 = vmul.f32 %v2392_v26, %v2232_v56  ;;  %v930_v6 = vmul.f32 %v2427_v22, %v2271_v7  ;;  %v931_v43 = vmul.f32 %v2429_v38, %v2271_v7  ;;  %v722_v37 = vadd.f32 %v658_v25, %v2440_v40 }
 0x119   : > { %v2570_v12 = vpop.permute.xlu1 %783  ;;  %v273_v18 = vpop.permute.xlu0 %272  ;;  %v723_v39 = vadd.f32 %v659_v29, %v2444_v15  ;;  %v662_v55 = vmul.f32 %v2390_v32, %v2288_v13  ;;  %v663_v45 = vmul.f32 %v2392_v26, %v2288_v13  ;;  %v490_v40 = vmul.f32 %v2394_v30, %v2235_v57 }
 0x11a   : > { %v446_v41 = vmul.f32 %v2394_v30, %v273_v18  ;;  %v447_v33 = vmul.f32 %v2396_v31, %v273_v18  ;;  %v491_v15 = vmul.f32 %v2396_v31, %v2235_v57  ;;  %v700_v29 = vmul.f32 %v2390_v32, %v2237_v58 }
 0x11b   : > { %1208 = vperm.xlu1 %1840, %v263_v35   ;;  %v701_v18 = vmul.f32 %v2392_v26, %v2237_v58  ;;  %v937_v57 = vmul.f32 %v2429_v38, %v2279_v10  ;;  %v494_v58 = vmul.f32 %v2394_v30, %v2240_v59 }
 0x11c   : > { %v720_v3 = vadd.f32 %v656_v4, %v446_v41  ;;  %v721_v44 = vadd.f32 %v657_v23, %v447_v33  ;;  %v936_v4 = vmul.f32 %v2427_v22, %v2279_v10  ;;  %v666_v33 = vmul.f32 %v2390_v32, %v2298_v16  ;;  %v3389_v36 = vld [vmem:[#allocation36_spill] sm:$0xff] }
 0x11d   : > { %v792_v56 = vpop.permute.xlu1 %791  ;;  %v288_v46 = vpop.permute.xlu0 %287 }
 0x11e   : > { %v932_v47 = vmul.f32 %v2427_v22, %v792_v56  ;;  %v933_v48 = vmul.f32 %v2429_v38, %v792_v56  ;;  %v452_v7 = vmul.f32 %v2394_v30, %v288_v46  ;;  %v453_v19 = vmul.f32 %v2396_v31, %v288_v46 }
 0x11f   : > { %v2604_v50 = vadd.f32 %v930_v6, %v720_v3  ;;  %v2606_v34 = vadd.f32 %v931_v43, %v721_v44  ;;  %v667_v6 = vmul.f32 %v2392_v26, %v2298_v16  ;;  %v495_v44 = vmul.f32 %v2396_v31, %v2240_v59 }
 0x120   : > { %v726_v13 = vadd.f32 %v662_v55, %v452_v7  ;;  %v727_v51 = vadd.f32 %v663_v45, %v453_v19  ;;  %v2608_v35 = vadd.f32 %v932_v47, %v722_v37  ;;  %v2610_v25 = vadd.f32 %v933_v48, %v723_v39 }
 0x121   : > { %3326 = vst [vmem:[#allocation40_spill] sm:$0xff] %v2604_v50  ;;  %3327 = vst [vmem:[#allocation41_spill] sm:$0xff] %v2606_v34  ;;  %v2620_v23 = vpop.permute.xlu1 %795  ;;  %v298_v41 = vpop.permute.xlu0 %297  ;;  %v704_v39 = vmul.f32 %v2390_v32, %v2242_v60  ;;  %v705_v16 = vmul.f32 %v2392_v26, %v2242_v60  ;;  %v2640_v56 = vadd.f32 %v696_v9, %v486_v27  ;;  %v3369_v34 = vld [vmem:[#allocation20_spill] sm:$0xff]  ;;  %v3374_v50 = vld [vmem:[#allocation23_spill] sm:$0xff] }
 0x122   : > { %3328 = vst [vmem:[#allocation42_spill] sm:$0xff] %v2608_v35  ;;  %3329 = vst [vmem:[#allocation43_spill] sm:$0xff] %v2610_v25  ;;  %v456_v43 = vmul.f32 %v2394_v30, %v298_v41  ;;  %v457_v3 = vmul.f32 %v2396_v31, %v298_v41  ;;  %v2632_v10 = vadd.f32 %v936_v4, %v726_v13 }
 0x123   : > { %v2634_v37 = vadd.f32 %v937_v57, %v727_v51  ;;  %3332 = vst [vmem:[#allocation46_spill] sm:$0xff] %v2640_v56  ;;  %v2642_v46 = vadd.f32 %v697_v5, %v487_v42  ;;  %v940_v47 = vmul.f32 %v2427_v22, %v2290_v14  ;;  %v941_v59 = vmul.f32 %v2429_v38, %v2290_v14 }
 0x124   : > { %3330 = vst [vmem:[#allocation44_spill] sm:$0xff] %v2632_v10  ;;  %v730_v55 = vadd.f32 %v666_v33, %v456_v43  ;;  %v731_v45 = vadd.f32 %v667_v6, %v457_v3  ;;  %v670_v19 = vmul.f32 %v2390_v32, %v2308_v20  ;;  %v671_v60 = vmul.f32 %v2392_v26, %v2308_v20  ;;  %v3353_v10 = vld [vmem:[#allocation11_spill] sm:$0xff] }
 0x125   : > { %3331 = vst [vmem:[#allocation45_spill] sm:$0xff] %v2634_v37  ;;  %3333 = vst [vmem:[#allocation47_spill] sm:$0xff] %v2642_v46  ;;  %v2648_v48 = vpop.permute.xlu1 %803  ;;  %v308_v7 = vpop.permute.xlu0 %307  ;;  %v2656_v9 = vadd.f32 %v700_v29, %v490_v40  ;;  %v2658_v5 = vadd.f32 %v701_v18, %v491_v15  ;;  %v2664_v51 = vadd.f32 %v704_v39, %v494_v58 }
 0x126   : > { %v460_v27 = vmul.f32 %v2394_v30, %v308_v7  ;;  %v461_v42 = vmul.f32 %v2396_v31, %v308_v7  ;;  %v2660_v13 = vadd.f32 %v940_v47, %v730_v55  ;;  %v2662_v14 = vadd.f32 %v941_v59, %v731_v45  ;;  %v3343_v55 = vld [vmem:[#allocation6_spill] sm:$0xff]  ;;  %v3344_v7 = vld [vmem:[#allocation7_spill] sm:$0xff] }
 0x127   : > { %3334 = vst [vmem:[#allocation48_spill] sm:$0xff] %v2656_v9  ;;  %3335 = vst [vmem:[#allocation49_spill] sm:$0xff] %v2658_v5  ;;  %v2666_v4 = vadd.f32 %v705_v16, %v495_v44  ;;  %v498_v20 = vmul.f32 %v2394_v30, %v2246_v61  ;;  %v499_v33 = vmul.f32 %v2396_v31, %v2246_v61  ;;  %v3340_v61 = vld [vmem:[#allocation5_spill] sm:$0xff]  ;;  %v3381_v5 = vld [vmem:[#allocation27_spill] sm:$0xff] }
 0x128   : > { %3336 = vst [vmem:[#allocation50_spill] sm:$0xff] %v2660_v13  ;;  %3337 = vst [vmem:[#allocation51_spill] sm:$0xff] %v2662_v14  ;;  %v734_v57 = vadd.f32 %v670_v19, %v460_v27  ;;  %v735_v41 = vadd.f32 %v671_v60, %v461_v42  ;;  %v944_v40 = vmul.f32 %v2427_v22, %v2300_v17  ;;  %v3345_v27 = vld [vmem:[#allocation10_spill] sm:$0xff] }
 0x129   : > { %3338 = vst [vmem:[#allocation52_spill] sm:$0xff] %v2664_v51  ;;  %3339 = vst [vmem:[#allocation53_spill] sm:$0xff] %v2666_v4  ;;  %v945_v15 = vmul.f32 %v2429_v38, %v2300_v17  ;;  %v2676_v29 = vpop.permute.xlu1 %811  ;;  %v318_v18 = vpop.permute.xlu0 %317  ;;  %v674_v6 = vmul.f32 %v2390_v32, %v2318_v24  ;;  %v675_v43 = vmul.f32 %v2392_v26, %v2318_v24 }
 0x12a   : > { %v464_v3 = vmul.f32 %v2394_v30, %v318_v18  ;;  %v465_v58 = vmul.f32 %v2396_v31, %v318_v18  ;;  %v708_v44 = vmul.f32 %v2390_v32, %v3340_v61  ;;  %v709_v39 = vmul.f32 %v2392_v26, %v3340_v61 }
 0x12b   : > { %v2688_v17 = vadd.f32 %v944_v40, %v734_v57  ;;  %v2690_v16 = vadd.f32 %v945_v15, %v735_v41  ;;  %v502_v45 = vmul.f32 %v2394_v30, %v3343_v55  ;;  %v503_v24 = vmul.f32 %v2396_v31, %v3343_v55  ;;  %v3346_v15 = vld [vmem:[#allocation12_spill] sm:$0xff] }
 0x12c   : > { %v738_v47 = vadd.f32 %v674_v6, %v464_v3  ;;  %v739_v59 = vadd.f32 %v675_v43, %v465_v58  ;;  %v712_v19 = vmul.f32 %v2390_v32, %v3344_v7  ;;  %v713_v60 = vmul.f32 %v2392_v26, %v3344_v7  ;;  %v3347_v58 = vld [vmem:[#allocation8_spill] sm:$0xff] }
 0x12d   : > { %3341 = vst [vmem:[#allocation5_spill] sm:$0xff] %v2688_v17  ;;  %3342 = vst [vmem:[#allocation54_spill] sm:$0xff] %v2690_v16  ;;  %v948_v42 = vmul.f32 %v2427_v22, %v3345_v27  ;;  %v949_v57 = vmul.f32 %v2429_v38, %v3345_v27  ;;  %v2704_v41 = vpop.permute.xlu1 %819  ;;  %v328_v40 = vpop.permute.xlu0 %327  ;;  %v678_v18 = vmul.f32 %v2390_v32, %v3346_v15  ;;  %v3350_v16 = vld [vmem:[#allocation9_spill] sm:$0xff] }
 0x12e   : > { %v679_v6 = vmul.f32 %v2392_v26, %v3346_v15  ;;  %v468_v43 = vmul.f32 %v2394_v30, %v328_v40  ;;  %v469_v3 = vmul.f32 %v2396_v31, %v328_v40  ;;  %v506_v61 = vmul.f32 %v2394_v30, %v3347_v58 }
 0x12f   : > { %v507_v55 = vmul.f32 %v2396_v31, %v3347_v58  ;;  %v2716_v7 = vadd.f32 %v948_v42, %v738_v47  ;;  %v2718_v27 = vadd.f32 %v949_v57, %v739_v59  ;;  %v716_v17 = vmul.f32 %v2390_v32, %v3350_v16  ;;  %v3354_v57 = vld [vmem:[#allocation14_spill] sm:$0xff] }
 0x130   : > { %v717_v15 = vmul.f32 %v2392_v26, %v3350_v16  ;;  %v742_v14 = vadd.f32 %v678_v18, %v468_v43  ;;  %v743_v13 = vadd.f32 %v679_v6, %v469_v3  ;;  %v2724_v37 = vadd.f32 %v708_v44, %v498_v20 }
 0x131   : > { %3348 = vst [vmem:[#allocation6_spill] sm:$0xff] %v2716_v7  ;;  %3349 = vst [vmem:[#allocation7_spill] sm:$0xff] %v2718_v27  ;;  %v2726_v40 = vadd.f32 %v709_v39, %v499_v33  ;;  %v952_v25 = vmul.f32 %v2427_v22, %v3353_v10  ;;  %v953_v47 = vmul.f32 %v2429_v38, %v3353_v10  ;;  %v2732_v59 = vpop.permute.xlu1 %827  ;;  %v338_v42 = vpop.permute.xlu0 %337  ;;  %v3361_v7 = vld [vmem:[#allocation13_spill] sm:$0xff] }
 0x132   : > { %3351 = vst [vmem:[#allocation10_spill] sm:$0xff] %v2724_v37  ;;  %v682_v58 = vmul.f32 %v2390_v32, %v3354_v57  ;;  %v683_v16 = vmul.f32 %v2392_v26, %v3354_v57  ;;  %v472_v20 = vmul.f32 %v2394_v30, %v338_v42  ;;  %v473_v33 = vmul.f32 %v2396_v31, %v338_v42 }
 0x133   : > { %3352 = vst [vmem:[#allocation12_spill] sm:$0xff] %v2726_v40  ;;  %v2740_v44 = vadd.f32 %v712_v19, %v502_v45  ;;  %v2742_v39 = vadd.f32 %v713_v60, %v503_v24  ;;  %v2744_v18 = vadd.f32 %v952_v25, %v742_v14  ;;  %v2746_v10 = vadd.f32 %v953_v47, %v743_v13  ;;  %v3362_v45 = vld [vmem:[#allocation15_spill] sm:$0xff] }
 0x134   : > { %v2748_v6 = vadd.f32 %v716_v17, %v506_v61  ;;  %v2750_v43 = vadd.f32 %v717_v15, %v507_v55  ;;  %v746_v3 = vadd.f32 %v682_v58, %v472_v20  ;;  %v747_v27 = vadd.f32 %v683_v16, %v473_v33  ;;  %v3363_v17 = vld [vmem:[#allocation16_spill] sm:$0xff]  ;;  %v3367_v20 = vld [vmem:[#allocation18_spill] sm:$0xff] }
 0x135   : > { %3355 = vst [vmem:[#allocation8_spill] sm:$0xff] %v2740_v44  ;;  %3356 = vst [vmem:[#allocation9_spill] sm:$0xff] %v2742_v39  ;;  %v956_v57 = vmul.f32 %v2427_v22, %v3361_v7  ;;  %v957_v42 = vmul.f32 %v2429_v38, %v3361_v7  ;;  %v960_v24 = vmul.f32 %v2427_v22, %v3362_v45  ;;  %v2760_v13 = vpop.permute.xlu1 %835  ;;  %v348_v14 = vpop.permute.xlu0 %347  ;;  %v3364_v7 = vld [vmem:[#allocation17_spill] sm:$0xff]  ;;  %v3383_v44 = vld [vmem:[#allocation34_spill] sm:$0xff] }
 0x136   : > { %3357 = vst [vmem:[#allocation11_spill] sm:$0xff] %v2744_v18  ;;  %3358 = vst [vmem:[#allocation14_spill] sm:$0xff] %v2746_v10  ;;  %v961_v25 = vmul.f32 %v2429_v38, %v3362_v45  ;;  %v686_v19 = vmul.f32 %v2390_v32, %v3363_v17  ;;  %v687_v60 = vmul.f32 %v2392_v26, %v3363_v17  ;;  %v3368_v18 = vld [vmem:[#allocation19_spill] sm:$0xff] }
 0x137   : > { %3359 = vst [vmem:[#allocation55_spill] sm:$0xff] %v2748_v6  ;;  %3360 = vst [vmem:[#allocation56_spill] sm:$0xff] %v2750_v43  ;;  %v476_v61 = vmul.f32 %v2394_v30, %v348_v14  ;;  %v477_v55 = vmul.f32 %v2396_v31, %v348_v14  ;;  %v964_v15 = vmul.f32 %v2427_v22, %v3364_v7  ;;  %v3375_v43 = vld [vmem:[#allocation24_spill] sm:$0xff] }
 0x138   : > { %v965_v47 = vmul.f32 %v2429_v38, %v3364_v7  ;;  %v2772_v58 = vadd.f32 %v956_v57, %v746_v3  ;;  %v2774_v16 = vadd.f32 %v957_v42, %v747_v27  ;;  %v690_v33 = vmul.f32 %v2390_v32, %v3367_v20  ;;  %v3370_v7 = vld [vmem:[#allocation21_spill] sm:$0xff] }
 0x139   : > { %v691_v45 = vmul.f32 %v2392_v26, %v3367_v20  ;;  %v750_v17 = vadd.f32 %v686_v19, %v476_v61  ;;  %v751_v10 = vadd.f32 %v687_v60, %v477_v55  ;;  %v968_v14 = vmul.f32 %v2427_v22, %v3368_v18  ;;  %v2788_v57 = vpop.permute.xlu1 %843  ;;  %v358_v42 = vpop.permute.xlu0 %357 }
 0x13a   : > { %3365 = vst [vmem:[#allocation13_spill] sm:$0xff] %v2772_v58  ;;  %3366 = vst [vmem:[#allocation15_spill] sm:$0xff] %v2774_v16  ;;  %v969_v35 = vmul.f32 %v2429_v38, %v3368_v18  ;;  %v694_v3 = vmul.f32 %v2390_v32, %v3369_v34  ;;  %v695_v27 = vmul.f32 %v2392_v26, %v3369_v34  ;;  %v3371_v18 = vld [vmem:[#allocation22_spill] sm:$0xff] }
 0x13b   : > { %v972_v20 = vmul.f32 %v2427_v22, %v3370_v7  ;;  %v973_v19 = vmul.f32 %v2429_v38, %v3370_v7  ;;  %v480_v60 = vmul.f32 %v2394_v30, %v358_v42  ;;  %v481_v61 = vmul.f32 %v2396_v31, %v358_v42 }
 0x13c   : > { %v698_v55 = vmul.f32 %v2390_v32, %v3371_v18  ;;  %v699_v16 = vmul.f32 %v2392_v26, %v3371_v18  ;;  %v2800_v34 = vadd.f32 %v960_v24, %v750_v17  ;;  %v2802_v58 = vadd.f32 %v961_v25, %v751_v10  ;;  %v3376_v24 = vld [vmem:[#allocation25_spill] sm:$0xff] }
 0x13d   : > { %v2806_v40 = vmul.f32 %v2427_v22, %v3374_v50  ;;  %v2810_v7 = vmul.f32 %v2429_v38, %v3374_v50  ;;  %v754_v37 = vadd.f32 %v690_v33, %v480_v60  ;;  %v755_v42 = vadd.f32 %v691_v45, %v481_v61  ;;  %v2824_v17 = vpop.permute.xlu1 %851  ;;  %v368_v50 = vpop.permute.xlu0 %367  ;;  %v3378_v61 = vld [vmem:[#allocation37_spill] sm:$0xff] }
 0x13e   : > { %3372 = vst [vmem:[#allocation16_spill] sm:$0xff] %v2800_v34  ;;  %3373 = vst [vmem:[#allocation17_spill] sm:$0xff] %v2802_v58  ;;  %v702_v6 = vmul.f32 %v2390_v32, %v3375_v43  ;;  %v703_v18 = vmul.f32 %v2392_v26, %v3375_v43  ;;  %v2818_v10 = vmul.f32 %v2427_v22, %v3376_v24  ;;  %v3377_v58 = vld [vmem:[#allocation26_spill] sm:$0xff] }
 0x13f   : > { %v2822_v25 = vmul.f32 %v2429_v38, %v3376_v24  ;;  %v706_v33 = vmul.f32 %v2390_v32, %v3377_v58  ;;  %v707_v45 = vmul.f32 %v2392_v26, %v3377_v58  ;;  %v484_v60 = vmul.f32 %v2394_v30, %v368_v50 }
 0x140   : > { %v485_v43 = vmul.f32 %v2396_v31, %v368_v50  ;;  %v444_v34 = vmul.f32 %v2394_v30, %v3378_v61  ;;  %v445_v24 = vmul.f32 %v2396_v31, %v3378_v61  ;;  %v2836_v4 = vadd.f32 %v964_v15, %v754_v37  ;;  %v3384_v61 = vld [vmem:[#allocation35_spill] sm:$0xff] }
 0x141   : > { %v2838_v51 = vadd.f32 %v965_v47, %v755_v42  ;;  %v2842_v9 = vmul.f32 %v2427_v22, %v3381_v5  ;;  %v2846_v58 = vmul.f32 %v2429_v38, %v3381_v5  ;;  %v758_v39 = vadd.f32 %v694_v3, %v484_v60  ;;  %v2860_v42 = vpop.permute.xlu1 %859  ;;  %v378_v5 = vpop.permute.xlu0 %377 }
 0x142   : > { %3379 = vst [vmem:[#allocation18_spill] sm:$0xff] %v2836_v4  ;;  %v759_v50 = vadd.f32 %v695_v27, %v485_v43  ;;  %v2850_v46 = vmul.f32 %v2390_v32, %v3383_v44  ;;  %v2854_v37 = vmul.f32 %v2392_v26, %v3383_v44  ;;  %v928_v15 = vmul.f32 %v2427_v22, %v2570_v12  ;;  %v3387_v43 = vld [vmem:[#allocation28_spill] sm:$0xff]  ;;  %v3388_v4 = vld [vmem:[#allocation29_spill] sm:$0xff] }
 0x143   : > { %3380 = vst [vmem:[#allocation19_spill] sm:$0xff] %v2838_v51  ;;  %3382 = vst [vmem:[#allocation20_spill] sm:$0xff] %v2846_v58  ;;  %v929_v47 = vmul.f32 %v2429_v38, %v2570_v12  ;;  %v2864_v3 = vmul.f32 %v2427_v22, %v3384_v61  ;;  %v2868_v27 = vmul.f32 %v2429_v38, %v3384_v61 }
 0x144   : > { %v488_v44 = vmul.f32 %v2394_v30, %v378_v5  ;;  %v489_v60 = vmul.f32 %v2396_v31, %v378_v5  ;;  %v718_v51 = vadd.f32 %v3387_v43, %v444_v34  ;;  %v719_v56 = vadd.f32 %v3388_v4, %v445_v24 }
 0x145   : > { %3385 = vst [vmem:[#allocation21_spill] sm:$0xff] %v2864_v3  ;;  %3386 = vst [vmem:[#allocation22_spill] sm:$0xff] %v2868_v27  ;;  %v2874_v12 = vadd.f32 %v968_v14, %v758_v39  ;;  %v2876_v11 = vadd.f32 %v969_v35, %v759_v50  ;;  %v2880_v58 = vmul.f32 %v2390_v32, %v3389_v36  ;;  %v868_v39 = vpop.permute.xlu1 %867  ;;  %v388_v14 = vpop.permute.xlu0 %387 }
 0x146   : > { %v2884_v61 = vmul.f32 %v2392_v26, %v3389_v36  ;;  %v762_v27 = vadd.f32 %v698_v55, %v488_v44  ;;  %v763_v3 = vadd.f32 %v699_v16, %v489_v60  ;;  %v934_v5 = vmul.f32 %v2427_v22, %v2620_v23 }
 0x147   : > { %v935_v4 = vmul.f32 %v2429_v38, %v2620_v23  ;;  %v2890_v35 = vadd.f32 %v928_v15, %v718_v51  ;;  %v2892_v34 = vadd.f32 %v929_v47, %v719_v56  ;;  %v938_v32 = vmul.f32 %v2427_v22, %v2648_v48 }
 0x148   : > { %v939_v26 = vmul.f32 %v2429_v38, %v2648_v48  ;;  %v492_v36 = vmul.f32 %v2394_v30, %v388_v14  ;;  %v493_v16 = vmul.f32 %v2396_v31, %v388_v14  ;;  %v942_v55 = vmul.f32 %v2427_v22, %v2676_v29  ;;  %v3393_v14 = vld [vmem:[#allocation33_spill] sm:$0xff] }
 0x149   : > { %v943_v23 = vmul.f32 %v2429_v38, %v2676_v29  ;;  %v2904_v51 = vadd.f32 %v972_v20, %v762_v27  ;;  %v2906_v56 = vadd.f32 %v973_v19, %v763_v3  ;;  %v946_v24 = vmul.f32 %v2427_v22, %v2704_v41  ;;  %v876_v60 = vpop.permute.xlu1 %875  ;;  %v398_v29 = vpop.permute.xlu0 %397  ;;  %v3390_v20 = vld [vmem:[#allocation30_spill] sm:$0xff]  ;;  %v3391_v19 = vld [vmem:[#allocation31_spill] sm:$0xff] }
 0x14a   : > { %v947_v48 = vmul.f32 %v2429_v38, %v2704_v41  ;;  %v766_v50 = vadd.f32 %v702_v6, %v492_v36  ;;  %v767_v15 = vadd.f32 %v703_v18, %v493_v16  ;;  %v950_v47 = vmul.f32 %v2427_v22, %v2732_v59  ;;  %v3392_v6 = vld [vmem:[#allocation32_spill] sm:$0xff] }
 0x14b   : > { %v951_v44 = vmul.f32 %v2429_v38, %v2732_v59  ;;  %v2917_v27 = vadd.f32 %v934_v5, %v3390_v20  ;;  %v2920_v3 = vadd.f32 %v935_v4, %v3391_v19  ;;  %v496_v43 = vmul.f32 %v2394_v30, %v398_v29 }
 0x14c   : > { %v497_v41 = vmul.f32 %v2396_v31, %v398_v29  ;;  %v2925_v18 = vadd.f32 %v938_v32, %v3392_v6  ;;  %v2928_v36 = vadd.f32 %v939_v26, %v3393_v14  ;;  %v2931_v59 = vadd.f32 %v942_v55, %v2535_v52 }
 0x14d   : > { %v2934_v16 = vadd.f32 %v943_v23, %v2537_v49  ;;  %v2937_v5 = vadd.f32 %v2806_v40, %v766_v50  ;;  %v2940_v4 = vadd.f32 %v2810_v7, %v767_v15  ;;  %v770_v20 = vadd.f32 %v706_v33, %v496_v43  ;;  %v884_v55 = vpop.permute.xlu1 %883  ;;  %v408_v40 = vpop.permute.xlu0 %407 }
 0x14e   : > { %v771_v29 = vadd.f32 %v707_v45, %v497_v41  ;;  %v2943_v32 = vadd.f32 %v946_v24, %v2539_v28  ;;  %v2946_v26 = vadd.f32 %v947_v48, %v2541_v21  ;;  %v954_v52 = vmul.f32 %v2427_v22, %v2760_v13 }
 0x14f   : > { %v955_v49 = vmul.f32 %v2429_v38, %v2760_v13  ;;  %v2953_v23 = vadd.f32 %v950_v47, %v2543_v0  ;;  %v2956_v7 = vadd.f32 %v951_v44, %v2545_v63  ;;  %v958_v28 = vmul.f32 %v2427_v22, %v2788_v57 }
 0x150   : > { %v959_v21 = vmul.f32 %v2429_v38, %v2788_v57  ;;  %v500_v33 = vmul.f32 %v2394_v30, %v408_v40  ;;  %v501_v45 = vmul.f32 %v2396_v31, %v408_v40  ;;  %v962_v13 = vmul.f32 %v2427_v22, %v2824_v17  ;;  %v3401_v40 = vld [vmem:[#allocation47_spill] sm:$0xff] }
 0x151   : > { %v963_v0 = vmul.f32 %v2429_v38, %v2824_v17  ;;  %v2969_v24 = vadd.f32 %v2818_v10, %v770_v20  ;;  %v2972_v63 = vadd.f32 %v2822_v25, %v771_v29  ;;  %v966_v48 = vmul.f32 %v2427_v22, %v2860_v42  ;;  %v892_v44 = vpop.permute.xlu1 %891  ;;  %v418_v10 = vpop.permute.xlu0 %417 }
 0x152   : > { %v967_v57 = vmul.f32 %v2429_v38, %v2860_v42  ;;  %v774_v50 = vadd.f32 %v2850_v46, %v500_v33  ;;  %v775_v15 = vadd.f32 %v2854_v37, %v501_v45  ;;  %v970_v47 = vmul.f32 %v2427_v22, %v868_v39 }
 0x153   : > { %3394 = vst [vmem:[#allocation23_spill] sm:$0xff] %v2972_v63  ;;  %v971_v17 = vmul.f32 %v2429_v38, %v868_v39  ;;  %v2983_v19 = vadd.f32 %v954_v52, %v2547_v53  ;;  %v2986_v25 = vadd.f32 %v955_v49, %v2549_v62  ;;  %v504_v43 = vmul.f32 %v2394_v30, %v418_v10  ;;  %v3396_v62 = vld [vmem:[#allocation20_spill] sm:$0xff]  ;;  %v3400_v52 = vld [vmem:[#allocation46_spill] sm:$0xff] }
 0x154   : > { %v505_v42 = vmul.f32 %v2396_v31, %v418_v10  ;;  %v2991_v46 = vadd.f32 %v958_v28, %v2551_v54  ;;  %v2994_v37 = vadd.f32 %v959_v21, %v2553_v1  ;;  %v2997_v39 = vadd.f32 %v962_v13, %v2555_v8  ;;  %v3398_v54 = vld [vmem:[#allocation38_spill] sm:$0xff]  ;;  %v3399_v1 = vld [vmem:[#allocation39_spill] sm:$0xff]  ;;  %v3402_v13 = vld [vmem:[#allocation21_spill] sm:$0xff] }
 0x155   : > { %v3000_v41 = vadd.f32 %v963_v0, %v2557_v2  ;;  %v3003_v53 = vadd.f32 %v2842_v9, %v774_v50  ;;  %v3006_v6 = vadd.f32 %v3396_v62, %v775_v15  ;;  %v778_v30 = vadd.f32 %v2880_v58, %v504_v43  ;;  %v900_v29 = vpop.permute.xlu1 %899  ;;  %v1059_v9 = vpop.permute.xlu0 %1058  ;;  %v3407_v10 = vld [vmem:[#allocation9_spill] sm:$0xff]  ;;  %v3408_v62 = vld [vmem:[#allocation48_spill] sm:$0xff] }
 0x156   : > { %v779_v31 = vadd.f32 %v2884_v61, %v505_v42  ;;  %v3011_v14 = vadd.f32 %v966_v48, %v3398_v54  ;;  %v3014_v20 = vadd.f32 %v967_v57, %v3399_v1  ;;  %v974_v8 = vmul.f32 %v2427_v22, %v876_v60  ;;  %v3404_v48 = vld [vmem:[#allocation22_spill] sm:$0xff] }
 0x157   : > { %3395 = vst [vmem:[#allocation24_spill] sm:$0xff] %v3003_v53  ;;  %3397 = vst [vmem:[#allocation25_spill] sm:$0xff] %v3006_v6  ;;  %v975_v2 = vmul.f32 %v2429_v38, %v876_v60  ;;  %v3019_v49 = vadd.f32 %v970_v47, %v3400_v52  ;;  %v3022_v58 = vadd.f32 %v971_v17, %v3401_v40  ;;  %v3406_v47 = vld [vmem:[#allocation8_spill] sm:$0xff] }
 0x158   : > { %v986_v61 = vmul.f32 %v2427_v22, %v900_v29  ;;  %v987_v28 = vmul.f32 %v2429_v38, %v900_v29  ;;  %v1216_v21 = vadd.f32 %v1059_v9, %v2890_v35  ;;  %v1217_v33 = vadd.f32 %v1059_v9, %v2892_v34 }
 0x159   : > { %v978_v45 = vmul.f32 %v2427_v22, %v884_v55  ;;  %v979_v60 = vmul.f32 %v2429_v38, %v884_v55  ;;  %v3031_v0 = vadd.f32 %v3402_v13, %v778_v30  ;;  %v3034_v57 = vadd.f32 %v3404_v48, %v779_v31  ;;  %v908_v55 = vpop.permute.xlu1 %907  ;;  %v1074_v42 = vpop.permute.xlu0 %1073  ;;  %v3409_v31 = vld [vmem:[#allocation49_spill] sm:$0xff] }
 0x15a   : > { %v1280_v50 = vmax.f32 %v1216_v21, 0.0  ;;  %v1281_v15 = vmax.f32 %v1217_v33, 0.0  ;;  %v3037_v17 = vadd.f32 %v986_v61, %v3406_v47  ;;  %v3040_v43 = vadd.f32 %v987_v28, %v3407_v10  ;;  %v3411_v13 = vld [vmem:[#allocation53_spill] sm:$0xff] }
 0x15b   : > { %3403 = vst [vmem:[#allocation26_spill] sm:$0xff] %v3031_v0  ;;  %3405 = vst [vmem:[#allocation37_spill] sm:$0xff] %v3034_v57  ;;  %v982_v35 = vmul.f32 %v2427_v22, %v892_v44  ;;  %v983_v34 = vmul.f32 %v2429_v38, %v892_v44  ;;  %v3046_v30 = vadd.f32 %v974_v8, %v3408_v62  ;;  %v3410_v44 = vld [vmem:[#allocation52_spill] sm:$0xff] }
 0x15c   : > { %v3049_v54 = vadd.f32 %v975_v2, %v3409_v31  ;;  %v1344_v1 = vmin.f32 %v1280_v50, 3.0  ;;  %v1345_v29 = vmin.f32 %v1281_v15, 3.0  ;;  %v990_v9 = vmul.f32 %v2427_v22, %v908_v55  ;;  %v3412_v50 = vld [vmem:[#allocation55_spill] sm:$0xff]  ;;  %v3413_v22 = vld [vmem:[#allocation56_spill] sm:$0xff] }
 0x15d   : > { %v991_v52 = vmul.f32 %v2429_v38, %v908_v55  ;;  %v1222_v40 = vadd.f32 %v1074_v42, %v2917_v27  ;;  %v1223_v61 = vadd.f32 %v1074_v42, %v2920_v3  ;;  %v3056_v28 = vadd.f32 %v978_v45, %v3410_v44  ;;  %v1084_v10 = vpop.permute.xlu0 %1083  ;;  %v3414_v3 = vld [vmem:[#allocation10_spill] sm:$0xff]  ;;  %v3415_v45 = vld [vmem:[#allocation12_spill] sm:$0xff] }
 0x15e   : > { %v3059_v48 = vadd.f32 %v979_v60, %v3411_v13  ;;  %v1408_v8 = vadd.f32 3.0, %v1344_v1  ;;  %v1409_v2 = vadd.f32 3.0, %v1345_v29  ;;  %v3064_v15 = vadd.f32 %v990_v9, %v3412_v50  ;;  %v1064_v29 = vpop.permute.xlu1 %1063  ;;  %v3417_v50 = vld [vmem:[#allocation41_spill] sm:$0xff] }
 0x15f   : > { %v3067_v47 = vadd.f32 %v991_v52, %v3413_v22  ;;  %v1286_v38 = vmax.f32 %v1222_v40, 0.0  ;;  %v1287_v27 = vmax.f32 %v1223_v61, 0.0  ;;  %v3070_v55 = vadd.f32 %v982_v35, %v3414_v3  ;;  %v3416_v52 = vld [vmem:[#allocation40_spill] sm:$0xff] }
 0x160   : > { %v3073_v42 = vadd.f32 %v983_v34, %v3415_v45  ;;  %v1472_v60 = vmul.f32 %v1408_v8, %v1216_v21  ;;  %v1473_v62 = vmul.f32 %v1409_v2, %v1217_v33  ;;  %v1226_v31 = vadd.f32 %v1084_v10, %v2925_v18 }
 0x161   : > { %v1227_v1 = vadd.f32 %v1084_v10, %v2928_v36  ;;  %v1350_v9 = vmin.f32 %v1286_v38, 3.0  ;;  %v1351_v44 = vmin.f32 %v1287_v27, 3.0  ;;  %v1218_v13 = vadd.f32 %v1064_v29, %v3416_v52  ;;  %v1094_v33 = vpop.permute.xlu0 %1093 }
 0x162   : > { %v1219_v22 = vadd.f32 %v1064_v29, %v3417_v50  ;;  %v1536_v57 = vmul.f32 0.16666667, %v1472_v60  ;;  %v1537_v0 = vmul.f32 0.16666667, %v1473_v62  ;;  %v1290_v35 = vmax.f32 %v1226_v31, 0.0  ;;  %v1069_v38 = vpop.permute.xlu1 %1068 }
 0x163   : > { %v1291_v3 = vmax.f32 %v1227_v1, 0.0  ;;  %v1414_v6 = vadd.f32 3.0, %v1350_v9  ;;  %v1415_v34 = vadd.f32 3.0, %v1351_v44  ;;  %v1282_v45 = vmax.f32 %v1218_v13, 0.0 }
 0x164   : > { %v1283_v21 = vmax.f32 %v1219_v22, 0.0  ;;  %1600 = vst [vmem:[%s3079_s23] sm:$0xff] %v1536_v57  ;;  %1601 = vst [vmem:[%s3079_s23 + $0x8] sm:$0xff] %v1537_v0  ;;  %v1354_v18 = vmin.f32 %v1290_v35, 3.0  ;;  %v1230_v8 = vadd.f32 %v1094_v33, %v2931_v59  ;;  %v1231_v2 = vadd.f32 %v1094_v33, %v2934_v16 }
 0x165   : > { %v1355_v36 = vmin.f32 %v1291_v3, 3.0  ;;  %v1478_v27 = vmul.f32 %v1414_v6, %v1222_v40  ;;  %v1479_v10 = vmul.f32 %v1415_v34, %v1223_v61  ;;  %v1346_v60 = vmin.f32 %v1282_v45, 3.0  ;;  %v1104_v3 = vpop.permute.xlu0 %1103  ;;  %v3418_v34 = vld [vmem:[#allocation42_spill] sm:$0xff] }
 0x166   : > { %v1347_v62 = vmin.f32 %v1283_v21, 3.0  ;;  %v1418_v29 = vadd.f32 3.0, %v1354_v18  ;;  %v1294_v44 = vmax.f32 %v1230_v8, 0.0  ;;  %v1295_v52 = vmax.f32 %v1231_v2, 0.0  ;;  %v1079_v6 = vpop.permute.xlu1 %1078  ;;  %v3419_v21 = vld [vmem:[#allocation43_spill] sm:$0xff] }
 0x167   : > { %v1419_v9 = vadd.f32 3.0, %v1355_v36  ;;  %v1542_v50 = vmul.f32 0.16666667, %v1478_v27  ;;  %v1543_v57 = vmul.f32 0.16666667, %v1479_v10  ;;  %v1410_v0 = vadd.f32 3.0, %v1346_v60 }
 0x168   : > { %v1411_v35 = vadd.f32 3.0, %v1347_v62  ;;  %v1482_v53 = vmul.f32 %v1418_v29, %v1226_v31  ;;  %v1358_v63 = vmin.f32 %v1294_v44, 3.0  ;;  %v1359_v16 = vmin.f32 %v1295_v52, 3.0 }
 0x169   : > { %v1483_v59 = vmul.f32 %v1419_v9, %v1227_v1  ;;  %1606 = vst [vmem:[%s3079_s23 + $0x30] sm:$0xff] %v1542_v50  ;;  %1607 = vst [vmem:[%s3079_s23 + $0x38] sm:$0xff] %v1543_v57  ;;  %v1474_v40 = vmul.f32 %v1410_v0, %v1218_v13  ;;  %v1220_v45 = vadd.f32 %v1069_v38, %v3418_v34  ;;  %v3421_v50 = vld [vmem:[#allocation45_spill] sm:$0xff]  ;;  %v1114_v0 = vpop.permute.xlu0 %1113 }
 0x16a   : > { %v1475_v61 = vmul.f32 %v1411_v35, %v1219_v22  ;;  %v1221_v33 = vadd.f32 %v1069_v38, %v3419_v21  ;;  %v1546_v18 = vmul.f32 0.16666667, %v1482_v53  ;;  %v1422_v27 = vadd.f32 3.0, %v1358_v63  ;;  %v1089_v44 = vpop.permute.xlu1 %1088  ;;  %v3420_v38 = vld [vmem:[#allocation44_spill] sm:$0xff] }
 0x16b   : > { %v1547_v36 = vmul.f32 0.16666667, %v1483_v59  ;;  %v1423_v31 = vadd.f32 3.0, %v1359_v16  ;;  %v1538_v1 = vmul.f32 0.16666667, %v1474_v40  ;;  %v1284_v60 = vmax.f32 %v1220_v45, 0.0 }
 0x16c   : > { %v1539_v10 = vmul.f32 0.16666667, %v1475_v61  ;;  %v1285_v62 = vmax.f32 %v1221_v33, 0.0  ;;  %1610 = vst [vmem:[%s3079_s23 + $0x50] sm:$0xff] %v1546_v18  ;;  %v1486_v29 = vmul.f32 %v1422_v27, %v1230_v8  ;;  %v1234_v13 = vadd.f32 %v1104_v3, %v2943_v32 }
 0x16d   : > { %1611 = vst [vmem:[%s3079_s23 + $0x58] sm:$0xff] %v1547_v36  ;;  %v1487_v9 = vmul.f32 %v1423_v31, %v1231_v2  ;;  %v1235_v22 = vadd.f32 %v1104_v3, %v2946_v26  ;;  %1602 = vst [vmem:[%s3079_s23 + $0x10] sm:$0xff] %v1538_v1  ;;  %v1348_v53 = vmin.f32 %v1284_v60, 3.0  ;;  %v1224_v52 = vadd.f32 %v1079_v6, %v3420_v38  ;;  %v1124_v38 = vpop.permute.xlu0 %1123 }
 0x16e   : > { %1603 = vst [vmem:[%s3079_s23 + $0x18] sm:$0xff] %v1539_v10  ;;  %v1349_v63 = vmin.f32 %v1285_v62, 3.0  ;;  %v1225_v57 = vadd.f32 %v1079_v6, %v3421_v50  ;;  %v1550_v35 = vmul.f32 0.16666667, %v1486_v29  ;;  %v1298_v8 = vmax.f32 %v1234_v13, 0.0  ;;  %v1099_v18 = vpop.permute.xlu1 %1098 }
 0x16f   : > { %v1551_v59 = vmul.f32 0.16666667, %v1487_v9  ;;  %v1299_v2 = vmax.f32 %v1235_v22, 0.0  ;;  %v1412_v16 = vadd.f32 3.0, %v1348_v53  ;;  %v1288_v40 = vmax.f32 %v1224_v52, 0.0 }
 0x170   : > { %v1413_v32 = vadd.f32 3.0, %v1349_v63  ;;  %v1289_v26 = vmax.f32 %v1225_v57, 0.0  ;;  %1614 = vst [vmem:[%s3079_s23 + $0x70] sm:$0xff] %v1550_v35  ;;  %v1362_v3 = vmin.f32 %v1298_v8, 3.0  ;;  %v1238_v34 = vadd.f32 %v1114_v0, %v2953_v23  ;;  %v3423_v8 = vld [vmem:[#allocation51_spill] sm:$0xff] }
 0x171   : > { %1615 = vst [vmem:[%s3079_s23 + $0x78] sm:$0xff] %v1551_v59  ;;  %v1363_v61 = vmin.f32 %v1299_v2, 3.0  ;;  %v1239_v21 = vadd.f32 %v1114_v0, %v2956_v7  ;;  %v1476_v36 = vmul.f32 %v1412_v16, %v1220_v45  ;;  %v1352_v27 = vmin.f32 %v1288_v40, 3.0  ;;  %v3422_v0 = vld [vmem:[#allocation50_spill] sm:$0xff] }
 0x172   : > { %v1477_v6 = vmul.f32 %v1413_v32, %v1221_v33  ;;  %v1353_v31 = vmin.f32 %v1289_v26, 3.0  ;;  %v1426_v1 = vadd.f32 3.0, %v1362_v3  ;;  %v1302_v60 = vmax.f32 %v1238_v34, 0.0 }
 0x173   : > { %v1427_v10 = vadd.f32 3.0, %v1363_v61  ;;  %v1303_v62 = vmax.f32 %v1239_v21, 0.0  ;;  %v1540_v29 = vmul.f32 0.16666667, %v1476_v36  ;;  %v1416_v53 = vadd.f32 3.0, %v1352_v27 }
 0x174   : > { %v1541_v9 = vmul.f32 0.16666667, %v1477_v6  ;;  %v1417_v63 = vadd.f32 3.0, %v1353_v31  ;;  %v1490_v50 = vmul.f32 %v1426_v1, %v1234_v13  ;;  %v1366_v35 = vmin.f32 %v1302_v60, 3.0  ;;  %v1109_v13 = vpop.permute.xlu1 %1108  ;;  %v3424_v1 = vld [vmem:[#allocation5_spill] sm:$0xff]  ;;  %v3425_v60 = vld [vmem:[#allocation54_spill] sm:$0xff] }
 0x175   : > { %v1491_v23 = vmul.f32 %v1427_v10, %v1235_v22  ;;  %v1367_v7 = vmin.f32 %v1303_v62, 3.0  ;;  %1604 = vst [vmem:[%s3079_s23 + $0x20] sm:$0xff] %v1540_v29  ;;  %v1480_v45 = vmul.f32 %v1416_v53, %v1224_v52  ;;  %v1228_v59 = vadd.f32 %v1089_v44, %v3422_v0  ;;  %v1134_v29 = vpop.permute.xlu0 %1133 }
 0x176   : > { %1605 = vst [vmem:[%s3079_s23 + $0x28] sm:$0xff] %v1541_v9  ;;  %v1481_v33 = vmul.f32 %v1417_v63, %v1225_v57  ;;  %v1229_v2 = vadd.f32 %v1089_v44, %v3423_v8  ;;  %v1554_v16 = vmul.f32 0.16666667, %v1490_v50  ;;  %v1430_v40 = vadd.f32 3.0, %v1366_v35 }
 0x177   : > { %v1555_v32 = vmul.f32 0.16666667, %v1491_v23  ;;  %v1431_v26 = vadd.f32 3.0, %v1367_v7  ;;  %v1544_v22 = vmul.f32 0.16666667, %v1480_v45  ;;  %v1292_v61 = vmax.f32 %v1228_v59, 0.0 }
 0x178   : > { %v1545_v3 = vmul.f32 0.16666667, %v1481_v33  ;;  %v1293_v36 = vmax.f32 %v1229_v2, 0.0  ;;  %1618 = vst [vmem:[%s3079_s23 + $0x90] sm:$0xff] %v1554_v16  ;;  %v1494_v6 = vmul.f32 %v1430_v40, %v1238_v34  ;;  %v1242_v57 = vadd.f32 %v1124_v38, %v2983_v19  ;;  %v1119_v45 = vpop.permute.xlu1 %1118 }
 0x179   : > { %1619 = vst [vmem:[%s3079_s23 + $0x98] sm:$0xff] %v1555_v32  ;;  %v1495_v52 = vmul.f32 %v1431_v26, %v1239_v21  ;;  %v1243_v27 = vadd.f32 %v1124_v38, %v2986_v25  ;;  %1608 = vst [vmem:[%s3079_s23 + $0x40] sm:$0xff] %v1544_v22  ;;  %v1356_v44 = vmin.f32 %v1292_v61, 3.0  ;;  %v1232_v10 = vadd.f32 %v1099_v18, %v3424_v1 }
 0x17a   : > { %1609 = vst [vmem:[%s3079_s23 + $0x48] sm:$0xff] %v1545_v3  ;;  %v1357_v31 = vmin.f32 %v1293_v36, 3.0  ;;  %v1233_v62 = vadd.f32 %v1099_v18, %v3425_v60  ;;  %v1558_v9 = vmul.f32 0.16666667, %v1494_v6  ;;  %v1306_v63 = vmax.f32 %v1242_v57, 0.0  ;;  %v1144_v6 = vpop.permute.xlu0 %1143  ;;  %v3427_v60 = vld [vmem:[#allocation7_spill] sm:$0xff] }
 0x17b   : > { %v1559_v53 = vmul.f32 0.16666667, %v1495_v52  ;;  %v1307_v34 = vmax.f32 %v1243_v27, 0.0  ;;  %v1420_v21 = vadd.f32 3.0, %v1356_v44  ;;  %v1296_v19 = vmax.f32 %v1232_v10, 0.0 }
 0x17c   : > { %v1421_v50 = vadd.f32 3.0, %v1357_v31  ;;  %v1297_v23 = vmax.f32 %v1233_v62, 0.0  ;;  %1622 = vst [vmem:[%s3079_s23 + $0xb0] sm:$0xff] %v1558_v9  ;;  %v1370_v25 = vmin.f32 %v1306_v63, 3.0  ;;  %v1246_v35 = vadd.f32 %v1134_v29, %v2991_v46  ;;  %v3426_v31 = vld [vmem:[#allocation6_spill] sm:$0xff] }
 0x17d   : > { %1623 = vst [vmem:[%s3079_s23 + $0xb8] sm:$0xff] %v1559_v53  ;;  %v1371_v38 = vmin.f32 %v1307_v34, 3.0  ;;  %v1247_v7 = vadd.f32 %v1134_v29, %v2994_v37  ;;  %v1484_v33 = vmul.f32 %v1420_v21, %v1228_v59  ;;  %v1360_v0 = vmin.f32 %v1296_v19, 3.0 }
 0x17e   : > { %v1485_v18 = vmul.f32 %v1421_v50, %v1229_v2  ;;  %v1361_v8 = vmin.f32 %v1297_v23, 3.0  ;;  %v1434_v16 = vadd.f32 3.0, %v1370_v25  ;;  %v1310_v40 = vmax.f32 %v1246_v35, 0.0 }
 0x17f   : > { %v1435_v32 = vadd.f32 3.0, %v1371_v38  ;;  %v1311_v26 = vmax.f32 %v1247_v7, 0.0  ;;  %v1548_v22 = vmul.f32 0.16666667, %v1484_v33  ;;  %v1424_v61 = vadd.f32 3.0, %v1360_v0  ;;  %v3428_v33 = vld [vmem:[#allocation11_spill] sm:$0xff] }
 0x180   : > { %v1549_v3 = vmul.f32 0.16666667, %v1485_v18  ;;  %v1425_v36 = vadd.f32 3.0, %v1361_v8  ;;  %v1498_v52 = vmul.f32 %v1434_v16, %v1242_v57  ;;  %v1374_v44 = vmin.f32 %v1310_v40, 3.0  ;;  %v1129_v57 = vpop.permute.xlu1 %1128  ;;  %v3429_v0 = vld [vmem:[#allocation14_spill] sm:$0xff]  ;;  %v1154_v16 = vpop.permute.xlu0 %1153 }
 0x181   : > { %v1499_v46 = vmul.f32 %v1435_v32, %v1243_v27  ;;  %v1375_v37 = vmin.f32 %v1311_v26, 3.0  ;;  %1612 = vst [vmem:[%s3079_s23 + $0x60] sm:$0xff] %v1548_v22  ;;  %v1488_v59 = vmul.f32 %v1424_v61, %v1232_v10  ;;  %v1236_v1 = vadd.f32 %v1109_v13, %v3426_v31 }
 0x182   : > { %1613 = vst [vmem:[%s3079_s23 + $0x68] sm:$0xff] %v1549_v3  ;;  %v1489_v2 = vmul.f32 %v1425_v36, %v1233_v62  ;;  %v1237_v29 = vadd.f32 %v1109_v13, %v3427_v60  ;;  %v1562_v9 = vmul.f32 0.16666667, %v1498_v52  ;;  %v1438_v63 = vadd.f32 3.0, %v1374_v44 }
 0x183   : > { %v1563_v53 = vmul.f32 0.16666667, %v1499_v46  ;;  %v1439_v34 = vadd.f32 3.0, %v1375_v37  ;;  %v1552_v27 = vmul.f32 0.16666667, %v1488_v59  ;;  %v1300_v50 = vmax.f32 %v1236_v1, 0.0 }
 0x184   : > { %v1553_v21 = vmul.f32 0.16666667, %v1489_v2  ;;  %v1301_v19 = vmax.f32 %v1237_v29, 0.0  ;;  %1626 = vst [vmem:[%s3079_s23 + $0xd0] sm:$0xff] %v1562_v9  ;;  %v1502_v23 = vmul.f32 %v1438_v63, %v1246_v35  ;;  %v1250_v62 = vadd.f32 %v1144_v6, %v2997_v39  ;;  %v1139_v52 = vpop.permute.xlu1 %1138 }
 0x185   : > { %1627 = vst [vmem:[%s3079_s23 + $0xd8] sm:$0xff] %v1563_v53  ;;  %v1503_v10 = vmul.f32 %v1439_v34, %v1247_v7  ;;  %v1251_v25 = vadd.f32 %v1144_v6, %v3000_v41  ;;  %1616 = vst [vmem:[%s3079_s23 + $0x80] sm:$0xff] %v1552_v27  ;;  %v1364_v13 = vmin.f32 %v1300_v50, 3.0  ;;  %v1240_v18 = vadd.f32 %v1119_v45, %v3428_v33  ;;  %v1164_v27 = vpop.permute.xlu0 %1163 }
 0x186   : > { %1617 = vst [vmem:[%s3079_s23 + $0x88] sm:$0xff] %v1553_v21  ;;  %v1365_v38 = vmin.f32 %v1301_v19, 3.0  ;;  %v1241_v8 = vadd.f32 %v1119_v45, %v3429_v0  ;;  %v1566_v32 = vmul.f32 0.16666667, %v1502_v23  ;;  %v1314_v26 = vmax.f32 %v1250_v62, 0.0  ;;  %v3430_v19 = vld [vmem:[#allocation13_spill] sm:$0xff] }
 0x187   : > { %v1567_v40 = vmul.f32 0.16666667, %v1503_v10  ;;  %v1315_v35 = vmax.f32 %v1251_v25, 0.0  ;;  %v1428_v7 = vadd.f32 3.0, %v1364_v13  ;;  %v1304_v39 = vmax.f32 %v1240_v18, 0.0  ;;  %v3431_v10 = vld [vmem:[#allocation15_spill] sm:$0xff] }
 0x188   : > { %v1429_v22 = vadd.f32 3.0, %v1365_v38  ;;  %v1305_v3 = vmax.f32 %v1241_v8, 0.0  ;;  %1630 = vst [vmem:[%s3079_s23 + $0xf0] sm:$0xff] %v1566_v32  ;;  %v1378_v41 = vmin.f32 %v1314_v26, 3.0  ;;  %v1254_v36 = vadd.f32 %v1154_v16, %v3011_v14 }
 0x189   : > { %1631 = vst [vmem:[%s3079_s23 + $0xf8] sm:$0xff] %v1567_v40  ;;  %v1379_v61 = vmin.f32 %v1315_v35, 3.0  ;;  %v1255_v6 = vadd.f32 %v1154_v16, %v3014_v20  ;;  %v1492_v46 = vmul.f32 %v1428_v7, %v1236_v1  ;;  %v1368_v44 = vmin.f32 %v1304_v39, 3.0  ;;  %v3432_v39 = vld [vmem:[#allocation16_spill] sm:$0xff] }
 0x18a   : > { %v1493_v45 = vmul.f32 %v1429_v22, %v1237_v29  ;;  %v1369_v37 = vmin.f32 %v1305_v3, 3.0  ;;  %v1442_v59 = vadd.f32 3.0, %v1378_v41  ;;  %v1318_v31 = vmax.f32 %v1254_v36, 0.0  ;;  %v3433_v41 = vld [vmem:[#allocation17_spill] sm:$0xff] }
 0x18b   : > { %v1443_v2 = vadd.f32 3.0, %v1379_v61  ;;  %v1319_v60 = vmax.f32 %v1255_v6, 0.0  ;;  %v1556_v9 = vmul.f32 0.16666667, %v1492_v46  ;;  %v1432_v63 = vadd.f32 3.0, %v1368_v44  ;;  %v1174_v46 = vpop.permute.xlu0 %1173 }
 0x18c   : > { %v1557_v53 = vmul.f32 0.16666667, %v1493_v45  ;;  %v1433_v34 = vadd.f32 3.0, %v1369_v37  ;;  %v1506_v21 = vmul.f32 %v1442_v59, %v1250_v62  ;;  %v1382_v50 = vmin.f32 %v1318_v31, 3.0  ;;  %v1149_v62 = vpop.permute.xlu1 %1148 }
 0x18d   : > { %v1507_v14 = vmul.f32 %v1443_v2, %v1251_v25  ;;  %v1383_v20 = vmin.f32 %v1319_v60, 3.0  ;;  %1620 = vst [vmem:[%s3079_s23 + $0xa0] sm:$0xff] %v1556_v9  ;;  %v1496_v1 = vmul.f32 %v1432_v63, %v1240_v18  ;;  %v1244_v23 = vadd.f32 %v1129_v57, %v3430_v19 }
 0x18e   : > { %1621 = vst [vmem:[%s3079_s23 + $0xa8] sm:$0xff] %v1557_v53  ;;  %v1497_v29 = vmul.f32 %v1433_v34, %v1241_v8  ;;  %v1245_v13 = vadd.f32 %v1129_v57, %v3431_v10  ;;  %v1570_v38 = vmul.f32 0.16666667, %v1506_v21  ;;  %v1446_v0 = vadd.f32 3.0, %v1382_v50 }
 0x18f   : > { %v1571_v33 = vmul.f32 0.16666667, %v1507_v14  ;;  %v1447_v16 = vadd.f32 3.0, %v1383_v20  ;;  %v1560_v25 = vmul.f32 0.16666667, %v1496_v1  ;;  %v1308_v40 = vmax.f32 %v1244_v23, 0.0 }
 0x190   : > { %v1561_v32 = vmul.f32 0.16666667, %v1497_v29  ;;  %v1309_v26 = vmax.f32 %v1245_v13, 0.0  ;;  %1634 = vst [vmem:[%s3079_s23 + $0x110] sm:$0xff] %v1570_v38  ;;  %v1510_v35 = vmul.f32 %v1446_v0, %v1254_v36  ;;  %v1258_v8 = vadd.f32 %v1164_v27, %v3019_v49  ;;  %v1159_v53 = vpop.permute.xlu1 %1158  ;;  %v1184_v38 = vpop.permute.xlu0 %1183 }
 0x191   : > { %1635 = vst [vmem:[%s3079_s23 + $0x118] sm:$0xff] %v1571_v33  ;;  %v1511_v18 = vmul.f32 %v1447_v16, %v1255_v6  ;;  %v1259_v7 = vadd.f32 %v1164_v27, %v3022_v58  ;;  %1624 = vst [vmem:[%s3079_s23 + $0xc0] sm:$0xff] %v1560_v25  ;;  %v1372_v57 = vmin.f32 %v1308_v40, 3.0  ;;  %v1248_v3 = vadd.f32 %v1139_v52, %v3432_v39  ;;  %v3434_v16 = vld [vmem:[#allocation18_spill] sm:$0xff] }
 0x192   : > { %1625 = vst [vmem:[%s3079_s23 + $0xc8] sm:$0xff] %v1561_v32  ;;  %v1373_v22 = vmin.f32 %v1309_v26, 3.0  ;;  %v1249_v61 = vadd.f32 %v1139_v52, %v3433_v41  ;;  %v1574_v45 = vmul.f32 0.16666667, %v1510_v35  ;;  %v1322_v37 = vmax.f32 %v1258_v8, 0.0  ;;  %v3435_v32 = vld [vmem:[#allocation19_spill] sm:$0xff] }
 0x193   : > { %v1575_v44 = vmul.f32 0.16666667, %v1511_v18  ;;  %v1323_v36 = vmax.f32 %v1259_v7, 0.0  ;;  %v1436_v6 = vadd.f32 3.0, %v1372_v57  ;;  %v1312_v49 = vmax.f32 %v1248_v3, 0.0 }
 0x194   : > { %v1437_v59 = vadd.f32 3.0, %v1373_v22  ;;  %v1313_v2 = vmax.f32 %v1249_v61, 0.0  ;;  %1638 = vst [vmem:[%s3079_s23 + $0x130] sm:$0xff] %v1574_v45  ;;  %v1386_v58 = vmin.f32 %v1322_v37, 3.0  ;;  %v1262_v60 = vadd.f32 %v1174_v46, %v3046_v30 }
 0x195   : > { %1639 = vst [vmem:[%s3079_s23 + $0x138] sm:$0xff] %v1575_v44  ;;  %v1387_v31 = vmin.f32 %v1323_v36, 3.0  ;;  %v1263_v9 = vadd.f32 %v1174_v46, %v3049_v54  ;;  %v1500_v63 = vmul.f32 %v1436_v6, %v1244_v23  ;;  %v1376_v34 = vmin.f32 %v1312_v49, 3.0  ;;  %v1194_v6 = vpop.permute.xlu0 %1193 }
 0x196   : > { %v1501_v52 = vmul.f32 %v1437_v59, %v1245_v13  ;;  %v1377_v27 = vmin.f32 %v1313_v2, 3.0  ;;  %v1450_v21 = vadd.f32 3.0, %v1386_v58  ;;  %v1326_v50 = vmax.f32 %v1262_v60, 0.0 }
 0x197   : > { %v1451_v14 = vadd.f32 3.0, %v1387_v31  ;;  %v1327_v20 = vmax.f32 %v1263_v9, 0.0  ;;  %v1564_v1 = vmul.f32 0.16666667, %v1500_v63  ;;  %v1440_v19 = vadd.f32 3.0, %v1376_v34 }
 0x198   : > { %v1565_v29 = vmul.f32 0.16666667, %v1501_v52  ;;  %v1441_v10 = vadd.f32 3.0, %v1377_v27  ;;  %v1514_v33 = vmul.f32 %v1450_v21, %v1258_v8  ;;  %v1390_v0 = vmin.f32 %v1326_v50, 3.0  ;;  %v1169_v8 = vpop.permute.xlu1 %1168 }
 0x199   : > { %v1515_v30 = vmul.f32 %v1451_v14, %v1259_v7  ;;  %v1391_v54 = vmin.f32 %v1327_v20, 3.0  ;;  %1628 = vst [vmem:[%s3079_s23 + $0xe0] sm:$0xff] %v1564_v1  ;;  %v1504_v23 = vmul.f32 %v1440_v19, %v1248_v3  ;;  %v1252_v25 = vadd.f32 %v1149_v62, %v3434_v16 }
 0x19a   : > { %1629 = vst [vmem:[%s3079_s23 + $0xe8] sm:$0xff] %v1565_v29  ;;  %v1505_v13 = vmul.f32 %v1441_v10, %v1249_v61  ;;  %v1253_v40 = vadd.f32 %v1149_v62, %v3435_v32  ;;  %v1578_v26 = vmul.f32 0.16666667, %v1514_v33  ;;  %v1454_v18 = vadd.f32 3.0, %v1390_v0  ;;  %v1204_v33 = vpop.permute.xlu0 %1203 }
 0x19b   : > { %v1579_v35 = vmul.f32 0.16666667, %v1515_v30  ;;  %v1455_v57 = vadd.f32 3.0, %v1391_v54  ;;  %v1568_v7 = vmul.f32 0.16666667, %v1504_v23  ;;  %v1316_v39 = vmax.f32 %v1252_v25, 0.0 }
 0x19c   : > { %v1569_v22 = vmul.f32 0.16666667, %v1505_v13  ;;  %v1317_v41 = vmax.f32 %v1253_v40, 0.0  ;;  %1642 = vst [vmem:[%s3079_s23 + $0x150] sm:$0xff] %v1578_v26  ;;  %v1518_v46 = vmul.f32 %v1454_v18, %v1262_v60  ;;  %v1266_v61 = vadd.f32 %v1184_v38, %v3056_v28 }
 0x19d   : > { %1643 = vst [vmem:[%s3079_s23 + $0x158] sm:$0xff] %v1579_v35  ;;  %v1519_v3 = vmul.f32 %v1455_v57, %v1263_v9  ;;  %v1267_v45 = vadd.f32 %v1184_v38, %v3059_v48  ;;  %1632 = vst [vmem:[%s3079_s23 + $0x100] sm:$0xff] %v1568_v7  ;;  %v1380_v62 = vmin.f32 %v1316_v39, 3.0  ;;  %v1256_v37 = vadd.f32 %v1159_v53, %v2874_v12  ;;  %v1179_v12 = vpop.permute.xlu1 %1178 }
 0x19e   : > { %1633 = vst [vmem:[%s3079_s23 + $0x108] sm:$0xff] %v1569_v22  ;;  %v1381_v44 = vmin.f32 %v1317_v41, 3.0  ;;  %v1257_v36 = vadd.f32 %v1159_v53, %v2876_v11  ;;  %v1582_v59 = vmul.f32 0.16666667, %v1518_v46  ;;  %v1330_v2 = vmax.f32 %v1266_v61, 0.0 }
 0x19f   : > { %v1583_v49 = vmul.f32 0.16666667, %v1519_v3  ;;  %v1331_v58 = vmax.f32 %v1267_v45, 0.0  ;;  %v1444_v31 = vadd.f32 3.0, %v1380_v62  ;;  %v1320_v28 = vmax.f32 %v1256_v37, 0.0 }
 0x1a0   : > { %v1445_v60 = vadd.f32 3.0, %v1381_v44  ;;  %v1321_v9 = vmax.f32 %v1257_v36, 0.0  ;;  %1646 = vst [vmem:[%s3079_s23 + $0x170] sm:$0xff] %v1582_v59  ;;  %v1394_v48 = vmin.f32 %v1330_v2, 3.0  ;;  %v1270_v52 = vadd.f32 %v1194_v6, %v3070_v55 }
 0x1a1   : > { %1647 = vst [vmem:[%s3079_s23 + $0x178] sm:$0xff] %v1583_v49  ;;  %v1395_v63 = vmin.f32 %v1331_v58, 3.0  ;;  %v1271_v34 = vadd.f32 %v1194_v6, %v3073_v42  ;;  %v1508_v27 = vmul.f32 %v1444_v31, %v1252_v25  ;;  %v1384_v53 = vmin.f32 %v1320_v28, 3.0  ;;  %v1189_v35 = vpop.permute.xlu1 %1188 }
 0x1a2   : > { %v1509_v11 = vmul.f32 %v1445_v60, %v1253_v40  ;;  %v1385_v21 = vmin.f32 %v1321_v9, 3.0  ;;  %v1458_v14 = vadd.f32 3.0, %v1394_v48  ;;  %v1334_v20 = vmax.f32 %v1270_v52, 0.0 }
 0x1a3   : > { %v1459_v50 = vadd.f32 3.0, %v1395_v63  ;;  %v1335_v1 = vmax.f32 %v1271_v34, 0.0  ;;  %v1572_v29 = vmul.f32 0.16666667, %v1508_v27  ;;  %v1448_v10 = vadd.f32 3.0, %v1384_v53 }
 0x1a4   : > { %v1573_v19 = vmul.f32 0.16666667, %v1509_v11  ;;  %v1449_v38 = vadd.f32 3.0, %v1385_v21  ;;  %v1522_v30 = vmul.f32 %v1458_v14, %v1266_v61  ;;  %v1398_v0 = vmin.f32 %v1334_v20, 3.0 }
 0x1a5   : > { %v1523_v55 = vmul.f32 %v1459_v50, %v1267_v45  ;;  %v1399_v42 = vmin.f32 %v1335_v1, 3.0  ;;  %1636 = vst [vmem:[%s3079_s23 + $0x120] sm:$0xff] %v1572_v29  ;;  %v1512_v54 = vmul.f32 %v1448_v10, %v1256_v37  ;;  %v1260_v13 = vadd.f32 %v1169_v8, %v2904_v51  ;;  %v1214_v45 = vpop.permute.xlu0 %1213  ;;  %v3436_v29 = vld [vmem:[#allocation23_spill] sm:$0xff] }
 0x1a6   : > { %1637 = vst [vmem:[%s3079_s23 + $0x128] sm:$0xff] %v1573_v19  ;;  %v1513_v23 = vmul.f32 %v1449_v38, %v1257_v36  ;;  %v1261_v16 = vadd.f32 %v1169_v8, %v2906_v56  ;;  %v1586_v25 = vmul.f32 0.16666667, %v1522_v30  ;;  %v1462_v40 = vadd.f32 3.0, %v1398_v0 }
 0x1a7   : > { %v1587_v32 = vmul.f32 0.16666667, %v1523_v55  ;;  %v1463_v26 = vadd.f32 3.0, %v1399_v42  ;;  %v1576_v18 = vmul.f32 0.16666667, %v1512_v54  ;;  %v1324_v7 = vmax.f32 %v1260_v13, 0.0 }
 0x1a8   : > { %v1577_v57 = vmul.f32 0.16666667, %v1513_v23  ;;  %v1325_v22 = vmax.f32 %v1261_v16, 0.0  ;;  %1650 = vst [vmem:[%s3079_s23 + $0x190] sm:$0xff] %v1586_v25  ;;  %v1526_v39 = vmul.f32 %v1462_v40, %v1270_v52  ;;  %v1274_v46 = vadd.f32 %v1204_v33, %v3037_v17  ;;  %v3437_v25 = vld [vmem:[#allocation24_spill] sm:$0xff] }
 0x1a9   : > { %1651 = vst [vmem:[%s3079_s23 + $0x198] sm:$0xff] %v1587_v32  ;;  %v1527_v41 = vmul.f32 %v1463_v26, %v1271_v34  ;;  %v1275_v51 = vadd.f32 %v1204_v33, %v3040_v43  ;;  %1640 = vst [vmem:[%s3079_s23 + $0x140] sm:$0xff] %v1576_v18  ;;  %v1388_v56 = vmin.f32 %v1324_v7, 3.0  ;;  %v1264_v3 = vadd.f32 %v1179_v12, %v2937_v5  ;;  %v1199_v5 = vpop.permute.xlu1 %1198  ;;  %v3439_v18 = vld [vmem:[#allocation26_spill] sm:$0xff]  ;;  %v3440_v7 = vld [vmem:[#allocation37_spill] sm:$0xff] }
 0x1aa   : > { %1641 = vst [vmem:[%s3079_s23 + $0x148] sm:$0xff] %v1577_v57  ;;  %v1389_v8 = vmin.f32 %v1325_v22, 3.0  ;;  %v1265_v61 = vadd.f32 %v1179_v12, %v2940_v4  ;;  %v1590_v62 = vmul.f32 0.16666667, %v1526_v39  ;;  %v1338_v37 = vmax.f32 %v1274_v46, 0.0 }
 0x1ab   : > { %v1591_v44 = vmul.f32 0.16666667, %v1527_v41  ;;  %v1339_v36 = vmax.f32 %v1275_v51, 0.0  ;;  %v1452_v6 = vadd.f32 3.0, %v1388_v56  ;;  %v1328_v17 = vmax.f32 %v1264_v3, 0.0 }
 0x1ac   : > { %v1453_v59 = vadd.f32 3.0, %v1389_v8  ;;  %v1329_v49 = vmax.f32 %v1265_v61, 0.0  ;;  %1654 = vst [vmem:[%s3079_s23 + $0x1b0] sm:$0xff] %v1590_v62  ;;  %v1402_v43 = vmin.f32 %v1338_v37, 3.0  ;;  %v1278_v58 = vadd.f32 %v1214_v45, %v3064_v15 }
 0x1ad   : > { %1655 = vst [vmem:[%s3079_s23 + $0x1b8] sm:$0xff] %v1591_v44  ;;  %v1403_v2 = vmin.f32 %v1339_v36, 3.0  ;;  %v1279_v31 = vadd.f32 %v1214_v45, %v3067_v47  ;;  %v1516_v60 = vmul.f32 %v1452_v6, %v1260_v13  ;;  %v1392_v28 = vmin.f32 %v1328_v17, 3.0  ;;  %v1209_v55 = vpop.permute.xlu1 %1208 }
 0x1ae   : > { %v1517_v4 = vmul.f32 %v1453_v59, %v1261_v16  ;;  %v1393_v9 = vmin.f32 %v1329_v49, 3.0  ;;  %v1466_v48 = vadd.f32 3.0, %v1402_v43  ;;  %v1342_v52 = vmax.f32 %v1278_v58, 0.0 }
 0x1af   : > { %v1467_v63 = vadd.f32 3.0, %v1403_v2  ;;  %v1343_v34 = vmax.f32 %v1279_v31, 0.0  ;;  %v1580_v12 = vmul.f32 0.16666667, %v1516_v60  ;;  %v1456_v11 = vadd.f32 3.0, %v1392_v28 }
 0x1b0   : > { %v1581_v27 = vmul.f32 0.16666667, %v1517_v4  ;;  %v1457_v53 = vadd.f32 3.0, %v1393_v9  ;;  %v1530_v21 = vmul.f32 %v1466_v48, %v1274_v46  ;;  %v1406_v15 = vmin.f32 %v1342_v52, 3.0 }
 0x1b1   : > { %v1531_v14 = vmul.f32 %v1467_v63, %v1275_v51  ;;  %v1407_v50 = vmin.f32 %v1343_v34, 3.0  ;;  %1644 = vst [vmem:[%s3079_s23 + $0x160] sm:$0xff] %v1580_v12  ;;  %v1520_v47 = vmul.f32 %v1456_v11, %v1264_v3  ;;  %v1268_v1 = vadd.f32 %v1189_v35, %v2969_v24  ;;  %v3438_v24 = vld [vmem:[#allocation25_spill] sm:$0xff] }
 0x1b2   : > { %1645 = vst [vmem:[%s3079_s23 + $0x168] sm:$0xff] %v1581_v27  ;;  %v1521_v20 = vmul.f32 %v1457_v53, %v1265_v61  ;;  %v1269_v19 = vadd.f32 %v1189_v35, %v3436_v29  ;;  %v1594_v10 = vmul.f32 0.16666667, %v1530_v21  ;;  %v1470_v33 = vadd.f32 3.0, %v1406_v15 }
 0x1b3   : > { %v1595_v38 = vmul.f32 0.16666667, %v1531_v14  ;;  %v1471_v30 = vadd.f32 3.0, %v1407_v50  ;;  %v1584_v0 = vmul.f32 0.16666667, %v1520_v47  ;;  %v1332_v54 = vmax.f32 %v1268_v1, 0.0 }
 0x1b4   : > { %v1585_v42 = vmul.f32 0.16666667, %v1521_v20  ;;  %v1333_v23 = vmax.f32 %v1269_v19, 0.0  ;;  %1658 = vst [vmem:[%s3079_s23 + $0x1d0] sm:$0xff] %v1594_v10  ;;  %v1534_v13 = vmul.f32 %v1470_v33, %v1278_v58  ;;  %v1272_v32 = vadd.f32 %v1199_v5, %v3437_v25 }
 0x1b5   : > { %1659 = vst [vmem:[%s3079_s23 + $0x1d8] sm:$0xff] %v1595_v38  ;;  %v1535_v16 = vmul.f32 %v1471_v30, %v1279_v31  ;;  %v1273_v40 = vadd.f32 %v1199_v5, %v3438_v24  ;;  %1648 = vst [vmem:[%s3079_s23 + $0x180] sm:$0xff] %v1584_v0  ;;  %v1396_v26 = vmin.f32 %v1332_v54, 3.0  ;;  %v1276_v57 = vadd.f32 %v1209_v55, %v3439_v18 }
 0x1b6   : > { %1649 = vst [vmem:[%s3079_s23 + $0x188] sm:$0xff] %v1585_v42  ;;  %v1397_v35 = vmin.f32 %v1333_v23, 3.0  ;;  %v1277_v22 = vadd.f32 %v1209_v55, %v3440_v7  ;;  %v1598_v39 = vmul.f32 0.16666667, %v1534_v13  ;;  %v1336_v46 = vmax.f32 %v1272_v32, 0.0 }
 0x1b7   : > { %v1599_v41 = vmul.f32 0.16666667, %v1535_v16  ;;  %v1337_v51 = vmax.f32 %v1273_v40, 0.0  ;;  %v1460_v56 = vadd.f32 3.0, %v1396_v26  ;;  %v1340_v3 = vmax.f32 %v1276_v57, 0.0 }
 0x1b8   : > { %v1461_v8 = vadd.f32 3.0, %v1397_v35  ;;  %v1341_v61 = vmax.f32 %v1277_v22, 0.0  ;;  %1662 = vst [vmem:[%s3079_s23 + $0x1f0] sm:$0xff] %v1598_v39  ;;  %v1400_v45 = vmin.f32 %v1336_v46, 3.0 }
 0x1b9   : > { %1663 = vst [vmem:[%s3079_s23 + $0x1f8] sm:$0xff] %v1599_v41  ;;  %v1401_v62 = vmin.f32 %v1337_v51, 3.0  ;;  %v1524_v44 = vmul.f32 %v1460_v56, %v1268_v1  ;;  %v1404_v36 = vmin.f32 %v1340_v3, 3.0 }
 0x1ba   : > { %v1525_v37 = vmul.f32 %v1461_v8, %v1269_v19  ;;  %v1405_v6 = vmin.f32 %v1341_v61, 3.0  ;;  %v1464_v59 = vadd.f32 3.0, %v1400_v45 }
 0x1bb   : > { %v1465_v17 = vadd.f32 3.0, %v1401_v62  ;;  %v1588_v49 = vmul.f32 0.16666667, %v1524_v44  ;;  %v1468_v2 = vadd.f32 3.0, %v1404_v36 }
 0x1bc   : > { %v1589_v43 = vmul.f32 0.16666667, %v1525_v37  ;;  %v1469_v58 = vadd.f32 3.0, %v1405_v6  ;;  %v1528_v31 = vmul.f32 %v1464_v59, %v1272_v32 }
 0x1bd   : > { %v1529_v5 = vmul.f32 %v1465_v17, %v1273_v40  ;;  %1652 = vst [vmem:[%s3079_s23 + $0x1a0] sm:$0xff] %v1588_v49  ;;  %v1532_v60 = vmul.f32 %v1468_v2, %v1276_v57 }
 0x1be   : > { %1653 = vst [vmem:[%s3079_s23 + $0x1a8] sm:$0xff] %v1589_v43  ;;  %v1533_v4 = vmul.f32 %v1469_v58, %v1277_v22  ;;  %v1592_v28 = vmul.f32 0.16666667, %v1528_v31 }
 0x1bf   : > { %v1593_v9 = vmul.f32 0.16666667, %v1529_v5  ;;  %v1596_v48 = vmul.f32 0.16666667, %v1532_v60 }
 0x1c0   : > { %v1597_v63 = vmul.f32 0.16666667, %v1533_v4  ;;  %1656 = vst [vmem:[%s3079_s23 + $0x1c0] sm:$0xff] %v1592_v28 }
 0x1c1   : > { %1657 = vst [vmem:[%s3079_s23 + $0x1c8] sm:$0xff] %v1593_v9  ;;  %1660 = vst [vmem:[%s3079_s23 + $0x1e0] sm:$0xff] %v1596_v48 }
 0x1c2   : > { %1661 = vst [vmem:[%s3079_s23 + $0x1e8] sm:$0xff] %v1597_v63 }
 0x1c3   : > { %1854 = shalt.err (!%p1851_p5)
}
 0x1c4   : > { %s1855_s8 = scalar_lea.hbm %s3202_s29, 8192  ;;  %s1859_s11 = scalar_lea.hbm %s3261_s3, 16384 }
 0x1c5   : > { %p1856_p6 = scmp.ne.s32.totalorder %s3202_s29, %s1855_s8  ;;  %p1860_p10 = scmp.lt.u32.totalorder %s3202_s29, %s3261_s3 }
 0x1c6   : > { %p1861_p11 = scmp.lt.u32.totalorder %s1859_s11, %s1855_s8  ;;  %p1863_p13 = scmp.lt.u32.totalorder %s1855_s8, %s3202_s29 }
 0x1c7   : > { %p1857_p7 = pnand %p1856_p6, %p1987_p4 }
 0x1c8   : > { %p1862_p12 = por %p1861_p11, %p1860_p10 }
 0x1c9   : > { %p1858_p9 = pneg %p1857_p7 }
 0x1ca   : > { %p1864_p0 = por %p1863_p13, %p1862_p12 }
 0x1cc   : > { %p1865_p1 = pnand %p1864_p0, %p1858_p9 }
 0x1ce   : > { %1868 = shalt.err (!%p1865_p1)
}
 0x1cf   : > { %s1925_s21 = smov 256   ;;  %s1926_s23 = smov 16  }
 0x1d0   : > { %1774 = dma.vmem_to_hbm [thread:$0]  (%p1987_p4), %s3204_s27, 8192, %s3202_s29, %s3212_s30, %s1925_s21, %s1925_s21, %s1926_s23  }
 0x1d1 PF: > { %p1780_p2 = scmp.ge.s32.totalorder %s1919_s17, 2  ;;  %s1695_s26 = sand.u32 1, %s1899_s12  }
 0x1d2   : > { %s1696_s15 = scalar_lea.sflag [#allocation3], %s1695_s26 }
 0x1d3   : > { %p1777_p3 = pnand %p1780_p2, %p1994_p8 }
 0x1d5   : > { %1894 = dma.done.wait (!%p1777_p3), %s1696_s15, 8192  }
 0x1d6   : > { %1896 = vsyncadd (!%p1777_p3), %s1696_s15, 4294959104  ;;  %s16_s17 = sadd.s32 1, %s1919_s17   ;;  %s3441_s12 = smov %s1903_s13 }
 0x1d7   : > { %p13_p5 = scmp.ge.s32.totalorder %s16_s17, 4   ;;  %s3442_s13 = smov %s1907_s14 }
 0x1d8   : > { %s3443_s14 = smov %s2000_s25  ;;  %s3444_s15 = smov %s1915_s16 }
 0x1d9   : > { %s3445_s16 = smov %s3447_s20  ;;  %15 = sbr.rel (!%p13_p5) target bundleno = 4 (0x4), region = 67 }
 0x1e0   :  { %1701 = vsyncpa [#allocation3], 1 }
 0x1e1   :  { %1703 = vsyncpa [#allocation3 + $0x1], 1 }

</bundles_post_ra>
